<compile_context>
chip_gen: v5e
topology: v5e:2x2
jax: 0.10.0
libtpu: 0.0.40
codegen_flags: <defaults>
</compile_context>

<pallas_src>
import functools

import jax
import jax.numpy as jnp
from jax.experimental import pallas as pl
from jax.experimental.pallas import tpu as pltpu


def _round_up(v: int, m: int) -> int:
    return ((v + m - 1) // m) * m


# ---------------------------------------------------------------------------
# Kernel
# ---------------------------------------------------------------------------
def _make_decoder_kernel(num_layers: int, hidden_pad: int):
    L, Hp = num_layers, hidden_pad
    n_fixed = 11

    def kernel(*refs):
        (x_ref, enc_ref, h0_ref, c0_ref, weh_ref, wee_ref, be_ref,
         fcw_ref, fcb_ref, whh_ref, b_ref) = refs[:n_fixed]
        w_in_refs = refs[n_fixed:n_fixed + L]
        (pred_ref, h_out_ref, c_out_ref,
         es_ref, h_state_ref, c_state_ref) = refs[n_fixed + L:]

        t = pl.program_id(0)
        enc = enc_ref[...]                       # (B, S, Hp) cdt, VMEM-resident
        B, S, _ = enc.shape
        cdt = enc.dtype

        # --- once per sequence (grid step 0): load state + e_score prepass ---------
        @pl.when(t == 0)
        def _init():
            h_state_ref[...] = h0_ref[...]
            c_state_ref[...] = c0_ref[...]
            # encoder part of the energy score depends only on enc -> hoisted
            es_ref[...] = jnp.sum(enc.astype(jnp.float32) * wee_ref[...],
                                  axis=-1, keepdims=True)            # (B, S, 1)

        h_old = h_state_ref[...]                 # (L, B, Hp) f32 (state at t-1)
        c_old = c_state_ref[...]                 # (L, B, Hp) f32

        # --- attention --------------------------------------------------------------
        h_score = jnp.sum(h_old[L - 1] * weh_ref[...], axis=-1, keepdims=True)  # (B,1)
        energy = jnp.maximum(h_score.reshape(B, 1, 1) + es_ref[...] + be_ref[...],
                             0.0)                                    # (B, S, 1)
        m = jnp.max(energy, axis=1, keepdims=True)
        e = jnp.exp(energy - m)
        att = e / jnp.sum(e, axis=1, keepdims=True)                  # (B, S, 1) f32
        # context as a VPU multiply + XLU sublane reduce (avoids M=1 MXU matmuls)
        context = jnp.sum(att * enc.astype(jnp.float32), axis=1)     # (B, Hp) f32

        # --- multi-layer LSTM, one time step ----------------------------------------
        x_t = x_ref[...]                                             # (B, Ep) cdt
        layer_in = jnp.concatenate([context.astype(cdt), x_t], axis=-1)
        for l in range(L):
            # recurrent part depends only on the old state -> no dependence on the
            # attention chain, so the scheduler can overlap it with softmax/EUP work
            rec = jnp.dot(h_old[l].astype(cdt), whh_ref[l],
                          preferred_element_type=jnp.float32)        # (B, 4Hp)
            gates = (jnp.dot(layer_in, w_in_refs[l][...],
                             preferred_element_type=jnp.float32)
                     + rec + b_ref[l])                                # (B, 4Hp) f32
            # gate order after prepare_params is [i, f, o, g] (lane-aligned blocks)
            sig = jax.nn.sigmoid(gates[:, :3 * Hp])
            i_g = sig[:, :Hp]
            f_g = sig[:, Hp:2 * Hp]
            o_g = sig[:, 2 * Hp:3 * Hp]
            g_g = jnp.tanh(gates[:, 3 * Hp:])
            c_new = f_g * c_old[l] + i_g * g_g
            h_new = o_g * jnp.tanh(c_new)
            h_state_ref[l] = h_new
            c_state_ref[l] = c_new
            layer_in = h_new.astype(cdt)

        # --- output projection (lane-dense: Op is a multiple of 128) ----------------
        pred_ref[...] = (jnp.dot(layer_in, fcw_ref[...],
                                 preferred_element_type=jnp.float32)
                         + fcb_ref[...])

        # --- write the final state back once, at the last decode step ---------------
        @pl.when(t == pl.num_programs(0) - 1)
        def _finalize():
            h_out_ref[...] = h_state_ref[...]
            c_out_ref[...] = c_state_ref[...]

    return kernel


# ---------------------------------------------------------------------------
# One-time weight preparation (hoisted out of the decode path)
# ---------------------------------------------------------------------------
def _reorder_gates(w, H):
    """PyTorch gate blocks (i, f, g, o) -> (i, f, o, g) along axis 0 (size 4H)."""
    return jnp.concatenate([w[0:2 * H], w[3 * H:4 * H], w[2 * H:3 * H]], axis=0)


def prepare_params(params, *, num_layers, hidden_size, input_size,
                   compute_dtype=jnp.bfloat16):
    H, L, E = hidden_size, num_layers, input_size
    Hp = _round_up(H, 128)
    Ep = _round_up(E, 128)
    O = params["fc_w"].shape[0]
    Op = _round_up(O, 128)

    def pad_gate_cols(wt):
        """(in, 4H) with gate-column blocks [i,f,o,g] -> (in, 4Hp), each block padded."""
        n = wt.shape[0]
        wt = wt.reshape(n, 4, H)
        wt = jnp.pad(wt, ((0, 0), (0, 0), (0, Hp - H)))
        return wt.reshape(n, 4 * Hp)

    prepped = {}
    ew = params["energy_w"].astype(jnp.float32)                    # (1, 2H)
    prepped["we_h"] = jnp.pad(ew[:, :H], ((0, 0), (0, Hp - H)))    # (1, Hp)
    prepped["we_e"] = jnp.pad(ew[:, H:], ((0, 0), (0, Hp - H)))    # (1, Hp)
    prepped["be"] = params["energy_b"].reshape(1, 1).astype(jnp.float32)

    fcw = params["fc_w"].T.astype(jnp.float32)                     # (H, O)
    fcw = jnp.pad(fcw, ((0, Hp - H), (0, Op - O)))                 # (Hp, Op)
    prepped["fc_w"] = fcw.astype(compute_dtype)
    prepped["fc_b"] = jnp.pad(params["fc_b"].reshape(1, O).astype(jnp.float32),
                              ((0, 0), (0, Op - O)))               # (1, Op)

    lstm_in, whh_list, b_list = [], [], []
    for l in range(L):
        w_ih = _reorder_gates(params[f"w_ih_l{l}"], H).T           # (in_l, 4H)
        w_hh = _reorder_gates(params[f"w_hh_l{l}"], H).T           # (H, 4H)
        b = (_reorder_gates(params[f"b_ih_l{l}"], H)
             + _reorder_gates(params[f"b_hh_l{l}"], H)).reshape(1, 4 * H)

        w_hh = pad_gate_cols(w_hh)                                 # (H, 4Hp)
        w_hh = jnp.pad(w_hh, ((0, Hp - H), (0, 0)))                # (Hp, 4Hp)
        whh_list.append(w_hh.astype(compute_dtype))
        b_list.append(pad_gate_cols(b).astype(jnp.float32))        # (1, 4Hp)

        w_ih = pad_gate_cols(w_ih)                                 # (in_l, 4Hp)
        if l == 0:
            # lstm_input = cat([context, x]) -> first H input rows are the context
            w_ctx = jnp.pad(w_ih[:H], ((0, Hp - H), (0, 0)))       # (Hp, 4Hp)
            w_x = jnp.pad(w_ih[H:], ((0, Ep - E), (0, 0)))         # (Ep, 4Hp)
            w_in = jnp.concatenate([w_ctx, w_x], axis=0)           # (Hp+Ep, 4Hp)
        else:
            w_in = jnp.pad(w_ih, ((0, Hp - H), (0, 0)))            # (Hp, 4Hp)
        lstm_in.append(w_in.astype(compute_dtype))

    prepped["lstm_in"] = tuple(lstm_in)
    prepped["w_hh"] = jnp.stack(whh_list, axis=0)                  # (L, Hp, 4Hp)
    prepped["b"] = jnp.stack(b_list, axis=0)                       # (L, 1, 4Hp)
    return prepped


# ---------------------------------------------------------------------------
# Wrapper: multi-step decode (T decode steps inside one pallas_call)
# ---------------------------------------------------------------------------
@functools.partial(jax.jit,
                   static_argnames=("num_layers", "hidden_size", "output_size"))
def decoder_forward(x, encoder_output, hidden, cell, prepped,
                    *, num_layers: int, hidden_size: int, output_size: int):
    """x: (B, T, E); encoder_output: (B, S, H); hidden/cell: (L, B, H).
    Returns (prediction (B, T, O), hidden (L, B, H), cell (L, B, H)).
    T = 1 reproduces the PyTorch module's forward exactly; T > 1 is the same forward
    applied T times with the recurrent state carried inside the kernel."""
    L, H, O = num_layers, hidden_size, output_size
    B, T, E = x.shape
    S = encoder_output.shape[1]
    cdt = prepped["fc_w"].dtype
    Hp = prepped["we_h"].shape[1]
    Op = prepped["fc_w"].shape[1]
    Ep = prepped["lstm_in"][0].shape[0] - Hp
    G = 4 * Hp

    x_seq = jnp.pad(x, ((0, 0), (0, 0), (0, Ep - E))).astype(cdt).transpose(1, 0, 2)
    enc = jnp.pad(encoder_output, ((0, 0), (0, 0), (0, Hp - H))).astype(cdt)
    h0 = jnp.pad(hidden.astype(jnp.float32), ((0, 0), (0, 0), (0, Hp - H)))
    c0 = jnp.pad(cell.astype(jnp.float32), ((0, 0), (0, 0), (0, Hp - H)))

    inputs = [x_seq, enc, h0, c0,
              prepped["we_h"], prepped["we_e"], prepped["be"],
              prepped["fc_w"], prepped["fc_b"],
              prepped["w_hh"], prepped["b"], *prepped["lstm_in"]]

    c2 = lambda t: (0, 0)
    c3 = lambda t: (0, 0, 0)
    in_specs = [
        pl.BlockSpec((None, B, Ep), lambda t: (t, 0, 0)),   # x_t streamed per step
        pl.BlockSpec((B, S, Hp), c3),                       # encoder: resident
        pl.BlockSpec((L, B, Hp), c3),                       # initial hidden
        pl.BlockSpec((L, B, Hp), c3),                       # initial cell
        pl.BlockSpec((1, Hp), c2),                          # we_h
        pl.BlockSpec((1, Hp), c2),                          # we_e
        pl.BlockSpec((1, 1), c2),                           # energy bias
        pl.BlockSpec((Hp, Op), c2),                         # fc weight
        pl.BlockSpec((1, Op), c2),                          # fc bias
        pl.BlockSpec((L, Hp, G), c3),                       # stacked W_hh
        pl.BlockSpec((L, 1, G), c3),                        # stacked gate biases
    ] + [pl.BlockSpec(w.shape, c2) for w in prepped["lstm_in"]]

    out_specs = (
        pl.BlockSpec((None, B, Op), lambda t: (t, 0, 0)),   # pred_t streamed per step
        pl.BlockSpec((L, B, Hp), c3),                       # final hidden
        pl.BlockSpec((L, B, Hp), c3),                       # final cell
    )
    out_shape = (
        jax.ShapeDtypeStruct((T, B, Op), jnp.float32),
        jax.ShapeDtypeStruct((L, B, Hp), jnp.float32),
        jax.ShapeDtypeStruct((L, B, Hp), jnp.float32),
    )
    scratch = [
        pltpu.VMEM((B, S, 1), jnp.float32),     # hoisted e_score
        pltpu.VMEM((L, B, Hp), jnp.float32),    # hidden state across steps
        pltpu.VMEM((L, B, Hp), jnp.float32),    # cell state across steps
    ]

    # VMEM budget sized from the actual buffers (x2 for pipelining), clamped to the
    # 64 MiB physical ceiling of v7x.
    est = sum(int(a.size) * a.dtype.itemsize for a in inputs)
    est += int(T * B * Op + 2 * L * B * Hp) * 4
    est += int(B * S + 2 * L * B * Hp) * 4
    vmem_limit = int(min(max(2 * est + (8 << 20), 32 << 20), 64 << 20))

    kernel = _make_decoder_kernel(L, Hp)
    pred, h_out, c_out = pl.pallas_call(
        kernel,
        grid=(T,),
        out_shape=out_shape,
        in_specs=in_specs,
        out_specs=out_specs,
        scratch_shapes=scratch,
        compiler_params=pltpu.CompilerParams(
            dimension_semantics=("arbitrary",),
            vmem_limit_bytes=vmem_limit),
    )(*inputs)

    pred = pred[:, :, :O].transpose(1, 0, 2)                 # (B, T, O)
    return pred, h_out[:, :, :H], c_out[:, :, :H]


# ---------------------------------------------------------------------------
# Synthetic params + pure-JAX reference (f32) for validation
# ---------------------------------------------------------------------------
def _init_params(key, input_size, hidden_size, num_layers, output_size):
    H, E, L, O = hidden_size, input_size, num_layers, output_size
    lstm_input_size = H + E  # attention=True
    k = 1.0 / jnp.sqrt(H)
    params = {}
    keys = jax.random.split(key, 4 + 4 * L)
    params["energy_w"] = jax.random.uniform(keys[0], (1, 2 * H), jnp.float32, -k, k)
    params["energy_b"] = jax.random.uniform(keys[1], (1,), jnp.float32, -k, k)
    params["fc_w"] = jax.random.uniform(keys[2], (O, H), jnp.float32, -k, k)
    params["fc_b"] = jax.random.uniform(keys[3], (O,), jnp.float32, -k, k)
    for l in range(L):
        in_l = lstm_input_size if l == 0 else H
        kk = keys[4 + 4 * l: 8 + 4 * l]
        params[f"w_ih_l{l}"] = jax.random.uniform(kk[0], (4 * H, in_l), jnp.float32, -k, k)
        params[f"w_hh_l{l}"] = jax.random.uniform(kk[1], (4 * H, H), jnp.float32, -k, k)
        params[f"b_ih_l{l}"] = jax.random.uniform(kk[2], (4 * H,), jnp.float32, -k, k)
        params[f"b_hh_l{l}"] = jax.random.uniform(kk[3], (4 * H,), jnp.float32, -k, k)
    return params


def _reference_forward(params, x_seq, encoder_output, hidden, cell,
                       num_layers, hidden_size):
    """Pure f32 JAX re-implementation of the PyTorch Decoder applied T times."""
    H, L = hidden_size, num_layers
    B, T, _ = x_seq.shape
    S = encoder_output.shape[1]
    ew, eb = params["energy_w"], params["energy_b"]
    h, c = hidden, cell
    preds = []
    for t in range(T):
        x = x_seq[:, t, :]
        hr = jnp.broadcast_to(h[-1][:, None, :], (B, S, H))
        cat = jnp.concatenate([hr, encoder_output], axis=-1)          # (B,S,2H)
        energy = jax.nn.relu(cat @ ew.T + eb)                          # (B,S,1)
        att = jax.nn.softmax(energy, axis=1)
        context = jnp.sum(att * encoder_output, axis=1)                # (B,H)
        layer_in = jnp.concatenate([context, x], axis=-1)
        new_h, new_c = [], []
        for l in range(L):
            gates = (layer_in @ params[f"w_ih_l{l}"].T + h[l] @ params[f"w_hh_l{l}"].T
                     + params[f"b_ih_l{l}"] + params[f"b_hh_l{l}"])
            i_g = jax.nn.sigmoid(gates[:, 0:H])
            f_g = jax.nn.sigmoid(gates[:, H:2 * H])
            g_g = jnp.tanh(gates[:, 2 * H:3 * H])
            o_g = jax.nn.sigmoid(gates[:, 3 * H:4 * H])
            c_l = f_g * c[l] + i_g * g_g
            h_l = o_g * jnp.tanh(c_l)
            new_h.append(h_l)
            new_c.append(c_l)
            layer_in = h_l
        h, c = jnp.stack(new_h), jnp.stack(new_c)
        preds.append(layer_in @ params["fc_w"].T + params["fc_b"])
    return jnp.stack(preds, axis=1), h, c


if __name__ == "__main__":
    B, S, H, E, L, O = 2, 8, 32, 4, 2, 4

    key = jax.random.PRNGKey(0)
    k_p, k_x, k_enc, k_h, k_c = jax.random.split(key, 5)

    params = _init_params(k_p, input_size=E, hidden_size=H,
                          num_layers=L, output_size=O)
    prepped = prepare_params(params, num_layers=L, hidden_size=H, input_size=E,
                             compute_dtype=jnp.bfloat16)

    encoder_output = jax.random.normal(k_enc, (B, S, H), jnp.float32)
    hidden = jax.random.normal(k_h, (L, B, H), jnp.float32)
    cell = jax.random.normal(k_c, (L, B, H), jnp.float32)

    # --- single step (exactly the module's forward) -----------------------------
    x1 = jax.random.normal(k_x, (B, 1, E), jnp.float32)
    pred1, h1, c1 = decoder_forward(x1, encoder_output, hidden, cell, prepped,
                                    num_layers=L, hidden_size=H, output_size=O)
    jax.block_until_ready((pred1, h1, c1))
    assert pred1.shape == (B, 1, O)
    assert h1.shape == (L, B, H) and c1.shape == (L, B, H)
    assert bool(jnp.all(jnp.isfinite(pred1)))
    assert bool(jnp.all(jnp.isfinite(h1)))
    assert bool(jnp.all(jnp.isfinite(c1)))

    # --- multi-step decode: the grid carries hidden/cell inside the kernel ------
    T = 4
    x_seq = jax.random.normal(k_x, (B, T, E), jnp.float32)
    pred_seq, h_T, c_T = decoder_forward(x_seq, encoder_output, hidden, cell, prepped,
                                         num_layers=L, hidden_size=H, output_size=O)
    jax.block_until_ready((pred_seq, h_T, c_T))
    assert pred_seq.shape == (B, T, O)
    assert bool(jnp.all(jnp.isfinite(pred_seq)))

    # --- correctness vs the pure f32 reference (bf16 MXU -> loose tolerance) ----
    ref_pred, ref_h, ref_c = _reference_forward(params, x_seq, encoder_output,
                                                hidden, cell, L, H)
    assert bool(jnp.allclose(pred_seq, ref_pred, atol=5e-2, rtol=5e-2))
    assert bool(jnp.allclose(h_T, ref_h, atol=5e-2, rtol=5e-2))
    assert bool(jnp.allclose(c_T, ref_c, atol=5e-2, rtol=5e-2))

    print("KERNEL_OK")
</pallas_src>

<mosaic_0001>
module attributes {stable_mosaic.version = 11 : i64} {
  func.func @kernel(%arg0: i32, %arg1: memref<1x2x128xbf16, #tpu.memory_space<vmem>>, %arg2: memref<2x8x128xbf16, #tpu.memory_space<vmem>>, %arg3: memref<2x2x128xf32, #tpu.memory_space<vmem>>, %arg4: memref<2x2x128xf32, #tpu.memory_space<vmem>>, %arg5: memref<1x128xf32, #tpu.memory_space<vmem>>, %arg6: memref<1x128xf32, #tpu.memory_space<vmem>>, %arg7: memref<1x1xf32, #tpu.memory_space<vmem>>, %arg8: memref<128x128xbf16, #tpu.memory_space<vmem>>, %arg9: memref<1x128xf32, #tpu.memory_space<vmem>>, %arg10: memref<2x128x512xbf16, #tpu.memory_space<vmem>>, %arg11: memref<2x1x512xf32, #tpu.memory_space<vmem>>, %arg12: memref<256x512xbf16, #tpu.memory_space<vmem>>, %arg13: memref<128x512xbf16, #tpu.memory_space<vmem>>, %arg14: memref<1x2x128xf32, #tpu.memory_space<vmem>>, %arg15: memref<2x2x128xf32, #tpu.memory_space<vmem>>, %arg16: memref<2x2x128xf32, #tpu.memory_space<vmem>>, %arg17: memref<2x8x1xf32, #tpu.memory_space<vmem>>, %arg18: memref<2x2x128xf32, #tpu.memory_space<vmem>>, %arg19: memref<2x2x128xf32, #tpu.memory_space<vmem>>) attributes {dimension_semantics = [#tpu.dimension_semantics<arbitrary>], iteration_bounds = array<i64: 1>, scalar_prefetch = 0 : i64, scratch_operands = 3 : i64, tpu.core_type = #tpu.core_type<tc>, window_params = [{transform_indices = @transform_0, window_bounds = array<i64: 1, 2, 128>}, {pipeline_mode = #tpu.pipeline_mode<synchronous>, transform_indices = @transform_1, window_bounds = array<i64: 2, 8, 128>}, {pipeline_mode = #tpu.pipeline_mode<synchronous>, transform_indices = @transform_2, window_bounds = array<i64: 2, 2, 128>}, {pipeline_mode = #tpu.pipeline_mode<synchronous>, transform_indices = @transform_3, window_bounds = array<i64: 2, 2, 128>}, {pipeline_mode = #tpu.pipeline_mode<synchronous>, transform_indices = @transform_4, window_bounds = array<i64: 1, 128>}, {pipeline_mode = #tpu.pipeline_mode<synchronous>, transform_indices = @transform_5, window_bounds = array<i64: 1, 128>}, {pipeline_mode = #tpu.pipeline_mode<synchronous>, transform_indices = @transform_6, window_bounds = array<i64: 1, 1>}, {pipeline_mode = #tpu.pipeline_mode<synchronous>, transform_indices = @transform_7, window_bounds = array<i64: 128, 128>}, {pipeline_mode = #tpu.pipeline_mode<synchronous>, transform_indices = @transform_8, window_bounds = array<i64: 1, 128>}, {pipeline_mode = #tpu.pipeline_mode<synchronous>, transform_indices = @transform_9, window_bounds = array<i64: 2, 128, 512>}, {pipeline_mode = #tpu.pipeline_mode<synchronous>, transform_indices = @transform_10, window_bounds = array<i64: 2, 1, 512>}, {pipeline_mode = #tpu.pipeline_mode<synchronous>, transform_indices = @transform_11, window_bounds = array<i64: 256, 512>}, {pipeline_mode = #tpu.pipeline_mode<synchronous>, transform_indices = @transform_12, window_bounds = array<i64: 128, 512>}, {transform_indices = @transform_13, window_bounds = array<i64: 1, 2, 128>}, {pipeline_mode = #tpu.pipeline_mode<synchronous>, transform_indices = @transform_14, window_bounds = array<i64: 2, 2, 128>}, {pipeline_mode = #tpu.pipeline_mode<synchronous>, transform_indices = @transform_15, window_bounds = array<i64: 2, 2, 128>}]} {
    %c0 = arith.constant 0 : index
    %c0_0 = arith.constant 0 : index
    %c0_1 = arith.constant 0 : index
    %0 = vector.load %arg2[%c0, %c0_0, %c0_1] : memref<2x8x128xbf16, #tpu.memory_space<vmem>>, vector<2x8x128xbf16>
    %c0_i32 = arith.constant 0 : i32
    %1 = arith.cmpi eq, %arg0, %c0_i32 : i32
    %2 = arith.extui %1 : i1 to i32
    %c0_i32_2 = arith.constant 0 : i32
    %3 = arith.cmpi ne, %2, %c0_i32_2 : i32
    scf.if %3 {
      %c0_66 = arith.constant 0 : index
      %c0_67 = arith.constant 0 : index
      %c0_68 = arith.constant 0 : index
      %127 = vector.load %arg3[%c0_66, %c0_67, %c0_68] : memref<2x2x128xf32, #tpu.memory_space<vmem>>, vector<2x2x128xf32>
      %c0_69 = arith.constant 0 : index
      %c0_70 = arith.constant 0 : index
      %c0_71 = arith.constant 0 : index
      %128 = vector.load %arg18[%c0_69, %c0_70, %c0_71] : memref<2x2x128xf32, #tpu.memory_space<vmem>>, vector<2x2x128xf32>
      tpu.vector_store %arg18[%c0_69, %c0_70, %c0_71], %127 {strides = array<i32>} : memref<2x2x128xf32, #tpu.memory_space<vmem>>, vector<2x2x128xf32>,
      %c0_72 = arith.constant 0 : index
      %c0_73 = arith.constant 0 : index
      %c0_74 = arith.constant 0 : index
      %129 = vector.load %arg4[%c0_72, %c0_73, %c0_74] : memref<2x2x128xf32, #tpu.memory_space<vmem>>, vector<2x2x128xf32>
      %c0_75 = arith.constant 0 : index
      %c0_76 = arith.constant 0 : index
      %c0_77 = arith.constant 0 : index
      %130 = vector.load %arg19[%c0_75, %c0_76, %c0_77] : memref<2x2x128xf32, #tpu.memory_space<vmem>>, vector<2x2x128xf32>
      tpu.vector_store %arg19[%c0_75, %c0_76, %c0_77], %129 {strides = array<i32>} : memref<2x2x128xf32, #tpu.memory_space<vmem>>, vector<2x2x128xf32>,
      %131 = arith.extf %0 : vector<2x8x128xbf16> to vector<2x8x128xf32>
      %c0_78 = arith.constant 0 : index
      %c0_79 = arith.constant 0 : index
      %132 = vector.load %arg6[%c0_78, %c0_79] : memref<1x128xf32, #tpu.memory_space<vmem>>, vector<1x128xf32>
      %133 = vector.shape_cast %132 : vector<1x128xf32> to vector<1x1x128xf32>
      %134 = vector.broadcast %133 : vector<1x1x128xf32> to vector<2x8x128xf32>
      %135 = arith.mulf %131, %134 : vector<2x8x128xf32>
      %cst_80 = arith.constant dense<0.000000e+00> : vector<2x8xf32>
      %136 = vector.multi_reduction <add>, %135, %cst_80 [2] : vector<2x8x128xf32> to vector<2x8xf32>
      %137 = vector.shape_cast %136 : vector<2x8xf32> to vector<2x8x1xf32>
      %c0_81 = arith.constant 0 : index
      %c0_82 = arith.constant 0 : index
      %c0_83 = arith.constant 0 : index
      %138 = vector.load %arg17[%c0_81, %c0_82, %c0_83] : memref<2x8x1xf32, #tpu.memory_space<vmem>>, vector<2x8x1xf32>
      tpu.vector_store %arg17[%c0_81, %c0_82, %c0_83], %137 {strides = array<i32>} : memref<2x8x1xf32, #tpu.memory_space<vmem>>, vector<2x8x1xf32>,
    } else {
    }
    %c0_3 = arith.constant 0 : index
    %c0_4 = arith.constant 0 : index
    %c0_5 = arith.constant 0 : index
    %4 = vector.load %arg18[%c0_3, %c0_4, %c0_5] : memref<2x2x128xf32, #tpu.memory_space<vmem>>, vector<2x2x128xf32>
    %c0_6 = arith.constant 0 : index
    %c0_7 = arith.constant 0 : index
    %c0_8 = arith.constant 0 : index
    %5 = vector.load %arg19[%c0_6, %c0_7, %c0_8] : memref<2x2x128xf32, #tpu.memory_space<vmem>>, vector<2x2x128xf32>
    %6 = vector.extract_strided_slice %4 {offsets = [1, 0, 0], sizes = [1, 2, 128], strides = [1, 1, 1]} : vector<2x2x128xf32> to vector<1x2x128xf32>
    %7 = vector.shape_cast %6 : vector<1x2x128xf32> to vector<2x128xf32>
    %c0_9 = arith.constant 0 : index
    %c0_10 = arith.constant 0 : index
    %8 = vector.load %arg5[%c0_9, %c0_10] : memref<1x128xf32, #tpu.memory_space<vmem>>, vector<1x128xf32>
    %9 = vector.broadcast %8 : vector<1x128xf32> to vector<2x128xf32>
    %10 = arith.mulf %7, %9 : vector<2x128xf32>
    %cst = arith.constant dense<0.000000e+00> : vector<2xf32>
    %11 = vector.multi_reduction <add>, %10, %cst [1] : vector<2x128xf32> to vector<2xf32>
    %12 = vector.shape_cast %11 : vector<2xf32> to vector<2x1xf32>
    %13 = vector.shape_cast %12 : vector<2x1xf32> to vector<2x1x1xf32>
    %c0_11 = arith.constant 0 : index
    %c0_12 = arith.constant 0 : index
    %c0_13 = arith.constant 0 : index
    %14 = vector.load %arg17[%c0_11, %c0_12, %c0_13] : memref<2x8x1xf32, #tpu.memory_space<vmem>>, vector<2x8x1xf32>
    %15 = vector.broadcast %13 : vector<2x1x1xf32> to vector<2x8x1xf32>
    %16 = arith.addf %15, %14 : vector<2x8x1xf32>
    %c0_14 = arith.constant 0 : index
    %c0_15 = arith.constant 0 : index
    %17 = vector.load %arg7[%c0_14, %c0_15] : memref<1x1xf32, #tpu.memory_space<vmem>>, vector<1x1xf32>
    %18 = vector.shape_cast %17 : vector<1x1xf32> to vector<1x1x1xf32>
    %19 = vector.broadcast %18 : vector<1x1x1xf32> to vector<2x8x1xf32>
    %20 = arith.addf %16, %19 : vector<2x8x1xf32>
    %cst_16 = arith.constant 0.000000e+00 : f32
    %21 = vector.broadcast %cst_16 : f32 to vector<2x8x1xf32>
    %22 = arith.maximumf %20, %21 : vector<2x8x1xf32>
    %cst_17 = arith.constant dense<0xFF800000> : vector<2x1xf32>
    %23 = vector.multi_reduction <maximumf>, %22, %cst_17 [1] : vector<2x8x1xf32> to vector<2x1xf32>
    %24 = vector.shape_cast %23 : vector<2x1xf32> to vector<2x1x1xf32>
    %25 = vector.broadcast %24 : vector<2x1x1xf32> to vector<2x8x1xf32>
    %26 = arith.subf %22, %25 : vector<2x8x1xf32>
    %27 = math.exp %26 : vector<2x8x1xf32>
    %cst_18 = arith.constant dense<0.000000e+00> : vector<2x1xf32>
    %28 = vector.multi_reduction <add>, %27, %cst_18 [1] : vector<2x8x1xf32> to vector<2x1xf32>
    %29 = vector.shape_cast %28 : vector<2x1xf32> to vector<2x1x1xf32>
    %30 = vector.broadcast %29 : vector<2x1x1xf32> to vector<2x8x1xf32>
    %31 = arith.divf %27, %30 : vector<2x8x1xf32>
    %32 = arith.extf %0 : vector<2x8x128xbf16> to vector<2x8x128xf32>
    %33 = vector.broadcast %31 : vector<2x8x1xf32> to vector<2x8x128xf32>
    %34 = arith.mulf %33, %32 : vector<2x8x128xf32>
    %cst_19 = arith.constant dense<0.000000e+00> : vector<2x128xf32>
    %35 = vector.multi_reduction <add>, %34, %cst_19 [1] : vector<2x8x128xf32> to vector<2x128xf32>
    %c0_20 = arith.constant 0 : index
    %c0_21 = arith.constant 0 : index
    %c0_22 = arith.constant 0 : index
    %36 = vector.load %arg1[%c0_20, %c0_21, %c0_22] : memref<1x2x128xbf16, #tpu.memory_space<vmem>>, vector<1x2x128xbf16>
    %37 = vector.shape_cast %36 : vector<1x2x128xbf16> to vector<2x128xbf16>
    %38 = arith.truncf %35 : vector<2x128xf32> to vector<2x128xbf16>
    %39 = tpu.concatenate %38, %37 in 1 : vector<2x128xbf16>, vector<2x128xbf16> -> vector<2x256xbf16>
    %40 = vector.extract_strided_slice %4 {offsets = [0, 0, 0], sizes = [1, 2, 128], strides = [1, 1, 1]} : vector<2x2x128xf32> to vector<1x2x128xf32>
    %41 = vector.shape_cast %40 : vector<1x2x128xf32> to vector<2x128xf32>
    %42 = arith.truncf %41 : vector<2x128xf32> to vector<2x128xbf16>
    %c0_23 = arith.constant 0 : index
    %c0_24 = arith.constant 0 : index
    %c0_25 = arith.constant 0 : index
    %43 = vector.load %arg10[%c0_23, %c0_24, %c0_25] : memref<2x128x512xbf16, #tpu.memory_space<vmem>>, vector<1x128x512xbf16>
    %44 = vector.shape_cast %43 : vector<1x128x512xbf16> to vector<128x512xbf16>
    %cst_26 = arith.constant dense<0.000000e+00> : vector<2x512xf32>
    %45 = tpu.matmul %42, %44, %cst_26 {dimension_numbers = #tpu.dot_dimension_numbers<[1], [0], [0], [1], [0, 0, 1, 1], [], []>} : vector<2x128xbf16>, vector<128x512xbf16>, vector<2x512xf32> -> vector<2x512xf32>
    %c0_27 = arith.constant 0 : index
    %c0_28 = arith.constant 0 : index
    %46 = vector.load %arg12[%c0_27, %c0_28] : memref<256x512xbf16, #tpu.memory_space<vmem>>, vector<256x512xbf16>
    %cst_29 = arith.constant dense<0.000000e+00> : vector<2x512xf32>
    %47 = tpu.matmul %39, %46, %cst_29 {dimension_numbers = #tpu.dot_dimension_numbers<[1], [0], [0], [1], [0, 0, 1, 1], [], []>} : vector<2x256xbf16>, vector<256x512xbf16>, vector<2x512xf32> -> vector<2x512xf32>
    %48 = arith.addf %47, %45 : vector<2x512xf32>
    %c0_30 = arith.constant 0 : index
    %c0_31 = arith.constant 0 : index
    %c0_32 = arith.constant 0 : index
    %49 = vector.load %arg11[%c0_30, %c0_31, %c0_32] : memref<2x1x512xf32, #tpu.memory_space<vmem>>, vector<1x1x512xf32>
    %50 = vector.shape_cast %49 : vector<1x1x512xf32> to vector<1x512xf32>
    %51 = vector.broadcast %50 : vector<1x512xf32> to vector<2x512xf32>
    %52 = arith.addf %48, %51 : vector<2x512xf32>
    %53 = vector.extract_strided_slice %52 {offsets = [0, 0], sizes = [2, 384], strides = [1, 1]} : vector<2x512xf32> to vector<2x384xf32>
    %54 = arith.negf %53 : vector<2x384xf32>
    %55 = math.exp %54 : vector<2x384xf32>
    %cst_33 = arith.constant 1.000000e+00 : f32
    %56 = vector.broadcast %cst_33 : f32 to vector<2x384xf32>
    %57 = arith.addf %56, %55 : vector<2x384xf32>
    %58 = arith.divf %56, %57 : vector<2x384xf32>
    %59 = vector.extract_strided_slice %58 {offsets = [0, 0], sizes = [2, 128], strides = [1, 1]} : vector<2x384xf32> to vector<2x128xf32>
    %60 = vector.extract_strided_slice %58 {offsets = [0, 128], sizes = [2, 128], strides = [1, 1]} : vector<2x384xf32> to vector<2x128xf32>
    %61 = vector.extract_strided_slice %58 {offsets = [0, 256], sizes = [2, 128], strides = [1, 1]} : vector<2x384xf32> to vector<2x128xf32>
    %62 = vector.extract_strided_slice %52 {offsets = [0, 384], sizes = [2, 128], strides = [1, 1]} : vector<2x512xf32> to vector<2x128xf32>
    %63 = math.tanh %62 : vector<2x128xf32>
    %64 = vector.extract_strided_slice %5 {offsets = [0, 0, 0], sizes = [1, 2, 128], strides = [1, 1, 1]} : vector<2x2x128xf32> to vector<1x2x128xf32>
    %65 = vector.shape_cast %64 : vector<1x2x128xf32> to vector<2x128xf32>
    %66 = arith.mulf %60, %65 : vector<2x128xf32>
    %67 = arith.mulf %59, %63 : vector<2x128xf32>
    %68 = arith.addf %66, %67 : vector<2x128xf32>
    %69 = math.tanh %68 : vector<2x128xf32>
    %70 = arith.mulf %61, %69 : vector<2x128xf32>
    %c0_34 = arith.constant 0 : index
    %c0_35 = arith.constant 0 : index
    %c0_36 = arith.constant 0 : index
    %71 = vector.load %arg18[%c0_34, %c0_35, %c0_36] : memref<2x2x128xf32, #tpu.memory_space<vmem>>, vector<1x2x128xf32>
    %72 = vector.shape_cast %71 : vector<1x2x128xf32> to vector<2x128xf32>
    %73 = vector.shape_cast %70 : vector<2x128xf32> to vector<1x2x128xf32>
    tpu.vector_store %arg18[%c0_34, %c0_35, %c0_36], %73 {strides = array<i32>} : memref<2x2x128xf32, #tpu.memory_space<vmem>>, vector<1x2x128xf32>,
    %c0_37 = arith.constant 0 : index
    %c0_38 = arith.constant 0 : index
    %c0_39 = arith.constant 0 : index
    %74 = vector.load %arg19[%c0_37, %c0_38, %c0_39] : memref<2x2x128xf32, #tpu.memory_space<vmem>>, vector<1x2x128xf32>
    %75 = vector.shape_cast %74 : vector<1x2x128xf32> to vector<2x128xf32>
    %76 = vector.shape_cast %68 : vector<2x128xf32> to vector<1x2x128xf32>
    tpu.vector_store %arg19[%c0_37, %c0_38, %c0_39], %76 {strides = array<i32>} : memref<2x2x128xf32, #tpu.memory_space<vmem>>, vector<1x2x128xf32>,
    %77 = arith.truncf %70 : vector<2x128xf32> to vector<2x128xbf16>
    %78 = vector.extract_strided_slice %4 {offsets = [1, 0, 0], sizes = [1, 2, 128], strides = [1, 1, 1]} : vector<2x2x128xf32> to vector<1x2x128xf32>
    %79 = vector.shape_cast %78 : vector<1x2x128xf32> to vector<2x128xf32>
    %80 = arith.truncf %79 : vector<2x128xf32> to vector<2x128xbf16>
    %c1 = arith.constant 1 : index
    %c0_40 = arith.constant 0 : index
    %c0_41 = arith.constant 0 : index
    %81 = vector.load %arg10[%c1, %c0_40, %c0_41] : memref<2x128x512xbf16, #tpu.memory_space<vmem>>, vector<1x128x512xbf16>
    %82 = vector.shape_cast %81 : vector<1x128x512xbf16> to vector<128x512xbf16>
    %cst_42 = arith.constant dense<0.000000e+00> : vector<2x512xf32>
    %83 = tpu.matmul %80, %82, %cst_42 {dimension_numbers = #tpu.dot_dimension_numbers<[1], [0], [0], [1], [0, 0, 1, 1], [], []>} : vector<2x128xbf16>, vector<128x512xbf16>, vector<2x512xf32> -> vector<2x512xf32>
    %c0_43 = arith.constant 0 : index
    %c0_44 = arith.constant 0 : index
    %84 = vector.load %arg13[%c0_43, %c0_44] : memref<128x512xbf16, #tpu.memory_space<vmem>>, vector<128x512xbf16>
    %cst_45 = arith.constant dense<0.000000e+00> : vector<2x512xf32>
    %85 = tpu.matmul %77, %84, %cst_45 {dimension_numbers = #tpu.dot_dimension_numbers<[1], [0], [0], [1], [0, 0, 1, 1], [], []>} : vector<2x128xbf16>, vector<128x512xbf16>, vector<2x512xf32> -> vector<2x512xf32>
    %86 = arith.addf %85, %83 : vector<2x512xf32>
    %c1_46 = arith.constant 1 : index
    %c0_47 = arith.constant 0 : index
    %c0_48 = arith.constant 0 : index
    %87 = vector.load %arg11[%c1_46, %c0_47, %c0_48] : memref<2x1x512xf32, #tpu.memory_space<vmem>>, vector<1x1x512xf32>
    %88 = vector.shape_cast %87 : vector<1x1x512xf32> to vector<1x512xf32>
    %89 = vector.broadcast %88 : vector<1x512xf32> to vector<2x512xf32>
    %90 = arith.addf %86, %89 : vector<2x512xf32>
    %91 = vector.extract_strided_slice %90 {offsets = [0, 0], sizes = [2, 384], strides = [1, 1]} : vector<2x512xf32> to vector<2x384xf32>
    %92 = arith.negf %91 : vector<2x384xf32>
    %93 = math.exp %92 : vector<2x384xf32>
    %cst_49 = arith.constant 1.000000e+00 : f32
    %94 = vector.broadcast %cst_49 : f32 to vector<2x384xf32>
    %95 = arith.addf %94, %93 : vector<2x384xf32>
    %96 = arith.divf %94, %95 : vector<2x384xf32>
    %97 = vector.extract_strided_slice %96 {offsets = [0, 0], sizes = [2, 128], strides = [1, 1]} : vector<2x384xf32> to vector<2x128xf32>
    %98 = vector.extract_strided_slice %96 {offsets = [0, 128], sizes = [2, 128], strides = [1, 1]} : vector<2x384xf32> to vector<2x128xf32>
    %99 = vector.extract_strided_slice %96 {offsets = [0, 256], sizes = [2, 128], strides = [1, 1]} : vector<2x384xf32> to vector<2x128xf32>
    %100 = vector.extract_strided_slice %90 {offsets = [0, 384], sizes = [2, 128], strides = [1, 1]} : vector<2x512xf32> to vector<2x128xf32>
    %101 = math.tanh %100 : vector<2x128xf32>
    %102 = vector.extract_strided_slice %5 {offsets = [1, 0, 0], sizes = [1, 2, 128], strides = [1, 1, 1]} : vector<2x2x128xf32> to vector<1x2x128xf32>
    %103 = vector.shape_cast %102 : vector<1x2x128xf32> to vector<2x128xf32>
    %104 = arith.mulf %98, %103 : vector<2x128xf32>
    %105 = arith.mulf %97, %101 : vector<2x128xf32>
    %106 = arith.addf %104, %105 : vector<2x128xf32>
    %107 = math.tanh %106 : vector<2x128xf32>
    %108 = arith.mulf %99, %107 : vector<2x128xf32>
    %c1_50 = arith.constant 1 : index
    %c0_51 = arith.constant 0 : index
    %c0_52 = arith.constant 0 : index
    %109 = vector.load %arg18[%c1_50, %c0_51, %c0_52] : memref<2x2x128xf32, #tpu.memory_space<vmem>>, vector<1x2x128xf32>
    %110 = vector.shape_cast %109 : vector<1x2x128xf32> to vector<2x128xf32>
    %111 = vector.shape_cast %108 : vector<2x128xf32> to vector<1x2x128xf32>
    tpu.vector_store %arg18[%c1_50, %c0_51, %c0_52], %111 {strides = array<i32>} : memref<2x2x128xf32, #tpu.memory_space<vmem>>, vector<1x2x128xf32>,
    %c1_53 = arith.constant 1 : index
    %c0_54 = arith.constant 0 : index
    %c0_55 = arith.constant 0 : index
    %112 = vector.load %arg19[%c1_53, %c0_54, %c0_55] : memref<2x2x128xf32, #tpu.memory_space<vmem>>, vector<1x2x128xf32>
    %113 = vector.shape_cast %112 : vector<1x2x128xf32> to vector<2x128xf32>
    %114 = vector.shape_cast %106 : vector<2x128xf32> to vector<1x2x128xf32>
    tpu.vector_store %arg19[%c1_53, %c0_54, %c0_55], %114 {strides = array<i32>} : memref<2x2x128xf32, #tpu.memory_space<vmem>>, vector<1x2x128xf32>,
    %115 = arith.truncf %108 : vector<2x128xf32> to vector<2x128xbf16>
    %c0_56 = arith.constant 0 : index
    %c0_57 = arith.constant 0 : index
    %116 = vector.load %arg8[%c0_56, %c0_57] : memref<128x128xbf16, #tpu.memory_space<vmem>>, vector<128x128xbf16>
    %cst_58 = arith.constant dense<0.000000e+00> : vector<2x128xf32>
    %117 = tpu.matmul %115, %116, %cst_58 {dimension_numbers = #tpu.dot_dimension_numbers<[1], [0], [0], [1], [0, 0, 1, 1], [], []>} : vector<2x128xbf16>, vector<128x128xbf16>, vector<2x128xf32> -> vector<2x128xf32>
    %c0_59 = arith.constant 0 : index
    %c0_60 = arith.constant 0 : index
    %118 = vector.load %arg9[%c0_59, %c0_60] : memref<1x128xf32, #tpu.memory_space<vmem>>, vector<1x128xf32>
    %119 = vector.broadcast %118 : vector<1x128xf32> to vector<2x128xf32>
    %120 = arith.addf %117, %119 : vector<2x128xf32>
    %c0_61 = arith.constant 0 : index
    %c0_62 = arith.constant 0 : index
    %c0_63 = arith.constant 0 : index
    %121 = vector.load %arg14[%c0_61, %c0_62, %c0_63] : memref<1x2x128xf32, #tpu.memory_space<vmem>>, vector<1x2x128xf32>
    %122 = vector.shape_cast %121 : vector<1x2x128xf32> to vector<2x128xf32>
    %123 = vector.shape_cast %120 : vector<2x128xf32> to vector<1x2x128xf32>
    tpu.vector_store %arg14[%c0_61, %c0_62, %c0_63], %123 {strides = array<i32>} : memref<1x2x128xf32, #tpu.memory_space<vmem>>, vector<1x2x128xf32>,
    %c0_i32_64 = arith.constant 0 : i32
    %124 = arith.cmpi eq, %arg0, %c0_i32_64 : i32
    %125 = arith.extui %124 : i1 to i32
    %c0_i32_65 = arith.constant 0 : i32
    %126 = arith.cmpi ne, %125, %c0_i32_65 : i32
    scf.if %126 {
      %c0_66 = arith.constant 0 : index
      %c0_67 = arith.constant 0 : index
      %c0_68 = arith.constant 0 : index
      %127 = vector.load %arg18[%c0_66, %c0_67, %c0_68] : memref<2x2x128xf32, #tpu.memory_space<vmem>>, vector<2x2x128xf32>
      %c0_69 = arith.constant 0 : index
      %c0_70 = arith.constant 0 : index
      %c0_71 = arith.constant 0 : index
      %128 = vector.load %arg15[%c0_69, %c0_70, %c0_71] : memref<2x2x128xf32, #tpu.memory_space<vmem>>, vector<2x2x128xf32>
      tpu.vector_store %arg15[%c0_69, %c0_70, %c0_71], %127 {strides = array<i32>} : memref<2x2x128xf32, #tpu.memory_space<vmem>>, vector<2x2x128xf32>,
      %c0_72 = arith.constant 0 : index
      %c0_73 = arith.constant 0 : index
      %c0_74 = arith.constant 0 : index
      %129 = vector.load %arg19[%c0_72, %c0_73, %c0_74] : memref<2x2x128xf32, #tpu.memory_space<vmem>>, vector<2x2x128xf32>
      %c0_75 = arith.constant 0 : index
      %c0_76 = arith.constant 0 : index
      %c0_77 = arith.constant 0 : index
      %130 = vector.load %arg16[%c0_75, %c0_76, %c0_77] : memref<2x2x128xf32, #tpu.memory_space<vmem>>, vector<2x2x128xf32>
      tpu.vector_store %arg16[%c0_75, %c0_76, %c0_77], %129 {strides = array<i32>} : memref<2x2x128xf32, #tpu.memory_space<vmem>>, vector<2x2x128xf32>,
    } else {
    }
    return
  }
  func.func @transform_0(%arg0: i32) -> (i32, i32, i32) {
    %c0_i32 = arith.constant 0 : i32
    %c0_i32_0 = arith.constant 0 : i32
    %c0_i32_1 = arith.constant 0 : i32
    return %arg0, %c0_i32, %c0_i32_0 : i32, i32, i32
  }
  func.func @transform_1(%arg0: i32) -> (i32, i32, i32) {
    %c0_i32 = arith.constant 0 : i32
    %c0_i32_0 = arith.constant 0 : i32
    %c0_i32_1 = arith.constant 0 : i32
    %c0_i32_2 = arith.constant 0 : i32
    return %c0_i32, %c0_i32_0, %c0_i32_1 : i32, i32, i32
  }
  func.func @transform_2(%arg0: i32) -> (i32, i32, i32) {
    %c0_i32 = arith.constant 0 : i32
    %c0_i32_0 = arith.constant 0 : i32
    %c0_i32_1 = arith.constant 0 : i32
    %c0_i32_2 = arith.constant 0 : i32
    return %c0_i32, %c0_i32_0, %c0_i32_1 : i32, i32, i32
  }
  func.func @transform_3(%arg0: i32) -> (i32, i32, i32) {
    %c0_i32 = arith.constant 0 : i32
    %c0_i32_0 = arith.constant 0 : i32
    %c0_i32_1 = arith.constant 0 : i32
    %c0_i32_2 = arith.constant 0 : i32
    return %c0_i32, %c0_i32_0, %c0_i32_1 : i32, i32, i32
  }
  func.func @transform_4(%arg0: i32) -> (i32, i32) {
    %c0_i32 = arith.constant 0 : i32
    %c0_i32_0 = arith.constant 0 : i32
    %c0_i32_1 = arith.constant 0 : i32
    return %c0_i32, %c0_i32_0 : i32, i32
  }
  func.func @transform_5(%arg0: i32) -> (i32, i32) {
    %c0_i32 = arith.constant 0 : i32
    %c0_i32_0 = arith.constant 0 : i32
    %c0_i32_1 = arith.constant 0 : i32
    return %c0_i32, %c0_i32_0 : i32, i32
  }
  func.func @transform_6(%arg0: i32) -> (i32, i32) {
    %c0_i32 = arith.constant 0 : i32
    %c0_i32_0 = arith.constant 0 : i32
    %c0_i32_1 = arith.constant 0 : i32
    return %c0_i32, %c0_i32_0 : i32, i32
  }
  func.func @transform_7(%arg0: i32) -> (i32, i32) {
    %c0_i32 = arith.constant 0 : i32
    %c0_i32_0 = arith.constant 0 : i32
    %c0_i32_1 = arith.constant 0 : i32
    return %c0_i32, %c0_i32_0 : i32, i32
  }
  func.func @transform_8(%arg0: i32) -> (i32, i32) {
    %c0_i32 = arith.constant 0 : i32
    %c0_i32_0 = arith.constant 0 : i32
    %c0_i32_1 = arith.constant 0 : i32
    return %c0_i32, %c0_i32_0 : i32, i32
  }
  func.func @transform_9(%arg0: i32) -> (i32, i32, i32) {
    %c0_i32 = arith.constant 0 : i32
    %c0_i32_0 = arith.constant 0 : i32
    %c0_i32_1 = arith.constant 0 : i32
    %c0_i32_2 = arith.constant 0 : i32
    return %c0_i32, %c0_i32_0, %c0_i32_1 : i32, i32, i32
  }
  func.func @transform_10(%arg0: i32) -> (i32, i32, i32) {
    %c0_i32 = arith.constant 0 : i32
    %c0_i32_0 = arith.constant 0 : i32
    %c0_i32_1 = arith.constant 0 : i32
    %c0_i32_2 = arith.constant 0 : i32
    return %c0_i32, %c0_i32_0, %c0_i32_1 : i32, i32, i32
  }
  func.func @transform_11(%arg0: i32) -> (i32, i32) {
    %c0_i32 = arith.constant 0 : i32
    %c0_i32_0 = arith.constant 0 : i32
    %c0_i32_1 = arith.constant 0 : i32
    return %c0_i32, %c0_i32_0 : i32, i32
  }
  func.func @transform_12(%arg0: i32) -> (i32, i32) {
    %c0_i32 = arith.constant 0 : i32
    %c0_i32_0 = arith.constant 0 : i32
    %c0_i32_1 = arith.constant 0 : i32
    return %c0_i32, %c0_i32_0 : i32, i32
  }
  func.func @transform_13(%arg0: i32) -> (i32, i32, i32) {
    %c0_i32 = arith.constant 0 : i32
    %c0_i32_0 = arith.constant 0 : i32
    %c0_i32_1 = arith.constant 0 : i32
    return %arg0, %c0_i32, %c0_i32_0 : i32, i32, i32
  }
  func.func @transform_14(%arg0: i32) -> (i32, i32, i32) {
    %c0_i32 = arith.constant 0 : i32
    %c0_i32_0 = arith.constant 0 : i32
    %c0_i32_1 = arith.constant 0 : i32
    %c0_i32_2 = arith.constant 0 : i32
    return %c0_i32, %c0_i32_0, %c0_i32_1 : i32, i32, i32
  }
  func.func @transform_15(%arg0: i32) -> (i32, i32, i32) {
    %c0_i32 = arith.constant 0 : i32
    %c0_i32_0 = arith.constant 0 : i32
    %c0_i32_1 = arith.constant 0 : i32
    %c0_i32_2 = arith.constant 0 : i32
    return %c0_i32, %c0_i32_0, %c0_i32_1 : i32, i32, i32
  }
}

</mosaic_0001>

<bundles_post_ra>
// kernel: decoder_forward.1
= control target key start
LH: loop header
LB: loop body
LE: loop exit
PB: predicated region body
PF: predicated region fallthrough
CT: control target
= control target key end

     0   :  { %s3160_s0 = inlined_call_operand.vmem [shape: bf16[1,2,128], index: 0, kind: input, shape index: {}]   ;;  %s3161_s1 = inlined_call_operand.vmem [shape: bf16[2,8,128], index: 1, kind: input, shape index: {}]   ;;  %s3162_s2 = inlined_call_operand.vmem [shape: f32[2,2,128], index: 2, kind: input, shape index: {}]   ;;  %s3163_s3 = inlined_call_operand.vmem [shape: f32[2,2,128], index: 3, kind: input, shape index: {}]   ;;  %s3164_s4 = inlined_call_operand.vmem [shape: f32[1,128], index: 4, kind: input, shape index: {}]   ;;  %s3165_s5 = inlined_call_operand.vmem [shape: f32[1,128], index: 5, kind: input, shape index: {}]   ;;  %s3166_s6 = inlined_call_operand.<no memory space> [shape: f32[1,1], index: 6, kind: input, shape index: {}]   ;;  %s3167_s7 = inlined_call_operand.hbm [shape: bf16[128,128], index: 7, kind: input, shape index: {}]   ;;  %s3168_s8 = inlined_call_operand.vmem [shape: f32[1,128], index: 8, kind: input, shape index: {}]   ;;  %s3169_s9 = inlined_call_operand.hbm [shape: bf16[2,128,512], index: 9, kind: input, shape index: {}]   ;;  %s3170_s10 = inlined_call_operand.vmem [shape: f32[2,1,512], index: 10, kind: input, shape index: {}]   ;;  %s3171_s11 = inlined_call_operand.hbm [shape: bf16[256,512], index: 11, kind: input, shape index: {}]   ;;  %s3172_s12 = inlined_call_operand.hbm [shape: bf16[128,512], index: 12, kind: input, shape index: {}]   ;;  %s3173_s13 = inlined_call_operand.hbm [shape: f32[1,2,128], index: 13, kind: output, shape index: {0}]   ;;  %s3174_s14 = inlined_call_operand.hbm [shape: f32[2,2,128], index: 14, kind: output, shape index: {1}]   ;;  %s3175_s15 = inlined_call_operand.hbm [shape: f32[2,2,128], index: 15, kind: output, shape index: {2}]  }
   0x1   :  { %v21_v0 = vstv %s3166_s6 }
   0x2   :  { %22 = vst [vmem:[#allocation5] sm:$0x1] %v21_v0 }
   0x3   :  { %23 = vsyncpa [#allocation7], 0 }
   0x4   :  { %24 = vsyncpa [#allocation10], 0 }
   0x5   :  { %25 = vsyncpa [#allocation13], 0 }
   0x6   :  { %26 = vsyncpa [#allocation8], 0  ;;  %s61_s22 = sshll.u32 %s3169_s9, 4  ;;  %s62_s22 = int_to_ptr.hbm [resolvable:$true] %s61_s22 }
   0x7   :  { %27 = vsyncpa [#allocation16], 0  ;;  %s2901_s23 = smov [#allocation9]   ;;  %s46_s27 = sshll.u32 %s3167_s7, 4  ;;  %s47_s27 = int_to_ptr.hbm [resolvable:$true] %s46_s27 }
   0x8   :  { %s63_s24 = sshll.u32 %s2901_s23, 4  ;;  %s2902_s28 = smov 256   ;;  %s64_s24 = int_to_ptr.vmem [resolvable:$true] %s63_s24 }
   0x9   :  { %s2903_s6 = smov 16   ;;  %s2904_s29 = smov [#allocation6]  }
   0xa   :  { %69 = dma.hbm_to_vmem [thread:$0]  %s62_s22, 8192, %s64_s24, [#allocation10], %s2902_s28, %s2902_s28, %s2903_s6  }
   0xb   :  { %s48_s30 = sshll.u32 %s2904_s29, 4  ;;  %s2905_s16 = smov 64   ;;  %s49_s30 = int_to_ptr.vmem [resolvable:$true] %s48_s30 }
   0xc   :  { %s2906_s17 = smov 4   ;;  %s76_s19 = sshll.u32 %s3171_s11, 4  ;;  %s77_s19 = int_to_ptr.hbm [resolvable:$true] %s76_s19 }
   0xd   :  { %54 = dma.hbm_to_vmem [thread:$0]  %s47_s27, 1024, %s49_s30, [#allocation7], %s2905_s16, %s2905_s16, %s2906_s17  }
   0xe   :  { %s2907_s20 = smov [#allocation11]   ;;  %s89_s25 = sshll.u32 %s3172_s12, 4  ;;  %s90_s25 = int_to_ptr.hbm [resolvable:$true] %s89_s25 }
   0xf   :  { %s78_s21 = sshll.u32 %s2907_s20, 4  ;;  %s2908_s22 = smov [#allocation12]   ;;  %s79_s21 = int_to_ptr.vmem [resolvable:$true] %s78_s21 }
  0x10   :  { %84 = dma.hbm_to_vmem [thread:$0]  %s77_s19, 8192, %s79_s21, [#allocation10], %s2902_s28, %s2902_s28, %s2903_s6  }
  0x11   :  { %s91_s24 = sshll.u32 %s2908_s22, 4  ;;  %s92_s24 = int_to_ptr.vmem [resolvable:$true] %s91_s24 }
  0x12   :  { %97 = dma.hbm_to_vmem [thread:$0]  %s90_s25, 4096, %s92_s24, [#allocation13], %s2902_s28, %s2902_s28, %s2903_s6  }
  0x13   :  { %2891 = dma.done.wait [#allocation7], 1024  }
  0x14   :  { %2892 = vsyncadd [#allocation7], 4294966272 }
  0x15   :  { %2893 = dma.done.wait [#allocation10], 16384  }
  0x16   :  { %2894 = vsyncadd [#allocation10], 4294950912 }
  0x17   :  { %2895 = dma.done.wait [#allocation13], 4096  }
  0x18   :  { %2896 = vsyncadd [#allocation13], 4294963200  ;;  %v3013_v1 = vld [vmem:[%s3161_s1] sm:$0xff]   ;;  %vm152_vm0 = vcmask 1041408   ;;  %vm140_vm1 = vcmask 7168   ;;  %v2909_v26 = vmov 0  }
  0x19   :  { %v2678_v2 = vld [vmem:[%s3165_s5] ss:$0 sm:$0xff]  ;;  %v2659_v3 = vunpack.c.l.bf16 %v3013_v1  ;;  %v121_v4 = vld [vmem:[%s3162_s2 + $0x2] sm:$0x3]  ;;  %v2660_v6 = vunpack.c.h.bf16 %v3013_v1  ;;  %v2680_v16 = vld [vmem:[#allocation5] ss:$0 sm:$0xff]  ;;  %2675 = vset.pattern.permute.xlu1 %v2909_v26  ;;  %2676 = vset.pattern.permute.xlu2 %v2909_v26 }
  0x1a   :  { %123 = vst [vmem:[#allocation3 + $0x2] sm:$0x3] %v121_v4  ;;  %v2679_v7 = vld [vmem:[%s3164_s4] ss:$0 sm:$0xff]  ;;  %2677 = vset.pattern.permute.xlu0 %v2909_v26  ;;  %v1926_v55 = vld [vmem:[#allocation9 + $0xf0] sm:$0xf0] }
  0x1b   :  { %v134_v5 = vmul.f32 %v2678_v2, %v2659_v3  ;;  %v135_v9 = vmul.f32 %v2678_v2, %v2660_v6  ;;  %v2517_v54 = vld [vmem:[#allocation9 + $0xe4] sm:$0xf]  ;;  %v1910_v58 = vld [vmem:[#allocation9 + $0xd0] sm:$0xf0]  ;;  %v2518_v59 = vld [vmem:[#allocation9 + $0xec] sm:$0xf] }
  0x1c   :  { %v1929_v56 = vor.u32 %v2517_v54, %v1926_v55  ;;  %v2513_v57 = vld [vmem:[#allocation9 + $0xc4] sm:$0xf]  ;;  %v1934_v62 = vld [vmem:[#allocation9 + $0xf8] sm:$0xf0]  ;;  %v1924_v63 = vld [vmem:[#allocation9 + $0xe0] sm:$0xf] }
  0x1d   :  { %136 = vadd.xlane.f32.xlu0 %v134_v5  ;;  %v1913_v0 = vor.u32 %v2513_v57, %v1910_v58  ;;  %v1937_v2 = vor.u32 %v2518_v59, %v1934_v62  ;;  %v2519_v4 = vld [vmem:[#allocation9 + $0xec] sm:$0xf0]  ;;  %v1932_v5 = vld [vmem:[#allocation9 + $0xe8] sm:$0xf]  ;;  %v1878_v26 = vld [vmem:[#allocation9 + $0x90] sm:$0xf0] }
  0x1e   :  { %483 = vmatpush.bf16.msra.mxu1 %v1929_v56  ;;  %v2497_v55 = vld [vmem:[#allocation9 + $0x44] sm:$0xf]  ;;  %v2502_v59 = vld [vmem:[#allocation9 + $0x6c] sm:$0xf]  ;;  %v1860_v62 = vld [vmem:[#allocation9 + $0x60] sm:$0xf] }
  0x1f   :  { %509 = vmatpush.bf16.msra.mxu3 %v1937_v2  ;;  %vm273_vm10 = vcmask 1041409   ;;  %s1773_s20 = sshll.u32 %s3174_s14, 4  ;;  %s2910_s21 = smov [#allocation15]   ;;  %s1774_s20 = int_to_ptr.hbm [resolvable:$true] %s1773_s20 }
  0x20   :  { %s1771_s23 = sshll.u32 %s2910_s21, 4  ;;  %s1786_s22 = sshll.u32 %s3175_s15, 4  ;;  %s1772_s23 = int_to_ptr.vmem [resolvable:$true] %s1771_s23  ;;  %s1787_s22 = int_to_ptr.hbm [resolvable:$true] %s1786_s22 }
  0x21   :  { %v144_v8 = vld [vmem:[#allocation3 + $0x2] sm:$0x3]  ;;  %s2911_s24 = smov 32   ;;  %s2912_s11 = smov 2  }
  0x22   :  { %v151_v10 = vmul.f32 %v2679_v7, %v144_v8  ;;  %v2520_v7 = vld [vmem:[#allocation9 + $0xf4] sm:$0xf0]  ;;  %484 = vmatpush.bf16.msra.mxu1 %v1913_v0  ;;  %s2913_s26 = smov [#allocation17]   ;;  %s2914_s12 = smov [#allocation14]  }
  0x23   :  { %s1784_s27 = sshll.u32 %s2913_s26, 4  ;;  %s1761_s30 = sshll.u32 %s2914_s12, 4  ;;  %s1785_s27 = int_to_ptr.vmem [resolvable:$true] %s1784_s27  ;;  %s1762_s30 = int_to_ptr.vmem [resolvable:$true] %s1761_s30 }
  0x24   :  { %v153_v11 = vsel %vm152_vm0, %v151_v10, 0.0  ;;  %v1925_v10 = vor.u32 %v2519_v4, %v1924_v63  ;;  %v2503_v63 = vld [vmem:[#allocation9 + $0x6c] sm:$0xf0]  ;;  %s1763_s4 = sshll.u32 %s3173_s13, 4  ;;  %s1764_s4 = int_to_ptr.hbm [resolvable:$true] %s1763_s4 }
  0x25   :  { %154 = vadd.xlane.f32.xlu1 %v153_v11  ;;  %138 = vadd.xlane.f32.xlu0 %v135_v9  ;;  %v1933_v11 = vor.u32 %v2520_v7, %v1932_v5  ;;  %v1868_v5 = vld [vmem:[#allocation9 + $0x68] sm:$0xf]  ;;  %v2504_v7 = vld [vmem:[#allocation9 + $0x74] sm:$0xf0] }
  0x26   :  { %470 = vmatpush.bf16.msra.mxu0 %v1925_v10 }
  0x27   :  { %496 = vmatpush.bf16.msra.mxu2 %v1933_v11 }
  0x90   :  { %v137_v12 = vpop.xlane.xlu0 %136 }
  0x91   :  { %141 = vst.msk [vmem:[#allocation2] sm:$0xff] %vm140_vm1, %v137_v12  ;;  %v2509_v12 = vld [vmem:[#allocation9 + $0xa4] sm:$0xf] }
  0x98   :  { %v155_v13 = vpop.xlane.xlu1 %154  ;;  %v161_v14 = vld [vmem:[#allocation2] sm:$0xff]  ;;  %v139_v15 = vpop.xlane.xlu0 %138 }
  0x99   :  { %v157_v17 = vperm.slane %v155_v13, 0  ;;  %142 = vst.msk [vmem:[#allocation2 + $0x8] sm:$0xff] %vm140_vm1, %v139_v15  ;;  %v158_v20 = vperm.slane %v155_v13, 1  ;;  %v1894_v13 = vld [vmem:[#allocation9 + $0xb0] sm:$0xf0] }
  0x9a   :  { %v1918_v15 = vld [vmem:[#allocation9 + $0xd8] sm:$0xf0] }
  0x9b   :  { %v163_v18 = vadd.f32 %v161_v14, %v157_v17  ;;  %v2514_v14 = vld [vmem:[#allocation9 + $0xcc] sm:$0xf]  ;;  %v2515_v17 = vld [vmem:[#allocation9 + $0xcc] sm:$0xf0] }
  0x9d   :  { %v169_v19 = vadd.f32 %v2680_v16, %v163_v18 }
  0x9f   :  { %v171_v21 = vmax.f32 %v169_v19, 0.0  ;;  %v1897_v19 = vor.u32 %v2509_v12, %v1894_v13  ;;  %v1861_v12 = vor.u32 %v2503_v63, %v1860_v62  ;;  %v1869_v13 = vor.u32 %v2504_v7, %v1868_v5  ;;  %v2182_v63 = vld [vmem:[#allocation11 + $0x1f0] sm:$0xf0]  ;;  %v2579_v7 = vld [vmem:[#allocation11 + $0x1cc] sm:$0xf0] }
  0xa0   :  { %v162_v22 = vld [vmem:[#allocation2 + $0x8] sm:$0xff] }
  0xa1   :  { %v174_v23 = vsel %vm140_vm1, %v171_v21, -inf  ;;  %v164_v24 = vadd.f32 %v162_v22, %v158_v20  ;;  %v1921_v20 = vor.u32 %v2514_v14, %v1918_v15  ;;  %v1916_v22 = vld [vmem:[#allocation9 + $0xc8] sm:$0xf]  ;;  %485 = vmatpush.bf16.msra.mxu1 %v1897_v19  ;;  %v2498_v14 = vld [vmem:[#allocation9 + $0x4c] sm:$0xf] }
  0xa2   :  { %v175_v25 = vrot.slane %v174_v23, 4  ;;  %v2499_v19 = vld [vmem:[#allocation9 + $0x4c] sm:$0xf0] }
  0xa3   :  { %v170_v27 = vadd.f32 %v2680_v16, %v164_v24  ;;  %v1908_v16 = vld [vmem:[#allocation9 + $0xc0] sm:$0xf]  ;;  %510 = vmatpush.bf16.msra.mxu3 %v1921_v20  ;;  %v1852_v20 = vld [vmem:[#allocation9 + $0x48] sm:$0xf] }
  0xa4   :  { %v176_v28 = vmax.f32 %v174_v23, %v175_v25  ;;  %v2516_v23 = vld [vmem:[#allocation9 + $0xd4] sm:$0xf0]  ;;  %v2505_v25 = vld [vmem:[#allocation9 + $0x84] sm:$0xf] }
  0xa5   :  { %v172_v29 = vmax.f32 %v170_v27, 0.0  ;;  %v1917_v24 = vor.u32 %v2516_v23, %v1916_v22  ;;  %v2510_v27 = vld [vmem:[#allocation9 + $0xac] sm:$0xf]  ;;  %v2493_v22 = vld [vmem:[#allocation9 + $0x24] sm:$0xf] }
  0xa6   :  { %v177_v30 = vrot.slane %v176_v28, 2  ;;  %v1830_v23 = vld [vmem:[#allocation9 + $0x30] sm:$0xf0] }
  0xa7   :  { %v181_v31 = vsel %vm140_vm1, %v172_v29, -inf  ;;  %497 = vmatpush.bf16.msra.mxu2 %v1917_v24  ;;  %v2500_v24 = vld [vmem:[#allocation9 + $0x54] sm:$0xf0] }
  0xa8   :  { %v178_v32 = vmax.f32 %v176_v28, %v177_v30  ;;  %v182_v33 = vrot.slane %v181_v31, 4  ;;  %v1892_v30 = vld [vmem:[#allocation9 + $0xa0] sm:$0xf] }
  0xaa   :  { %v179_v34 = vrot.slane %v178_v32, 1  ;;  %v183_v35 = vmax.f32 %v181_v31, %v182_v33  ;;  %v1900_v33 = vld [vmem:[#allocation9 + $0xa8] sm:$0xf] }
  0xac   :  { %v180_v36 = vmax.f32 %v178_v32, %v179_v34  ;;  %v184_v37 = vrot.slane %v183_v35, 2  ;;  %v2511_v32 = vld [vmem:[#allocation9 + $0xac] sm:$0xf0]  ;;  %v2512_v34 = vld [vmem:[#allocation9 + $0xb4] sm:$0xf0] }
  0xae   :  { %v188_v38 = vsub.f32 %v171_v21, %v180_v36  ;;  %v185_v39 = vmax.f32 %v183_v35, %v184_v37  ;;  %v1909_v21 = vor.u32 %v2515_v17, %v1908_v16  ;;  %v1881_v36 = vor.u32 %v2505_v25, %v1878_v26 }
  0xaf   :  { %v1893_v37 = vor.u32 %v2511_v32, %v1892_v30  ;;  %v2489_v32 = vld [vmem:[#allocation9 + $0x4] sm:$0xf] }
  0xb0   :  { %v190_v40 = vmul.f32 1.442695, %v188_v38  ;;  %v186_v41 = vrot.slane %v185_v39, 1  ;;  %471 = vmatpush.bf16.msra.mxu0 %v1909_v21  ;;  %v1901_v38 = vor.u32 %v2512_v34, %v1900_v33  ;;  %486 = vmatpush.bf16.msra.mxu1 %v1881_v36  ;;  %v1838_v33 = vld [vmem:[#allocation9 + $0x38] sm:$0xf0] }
  0xb1   :  { %v1828_v34 = vld [vmem:[#allocation9 + $0x20] sm:$0xf] }
  0xb2   :  { %2682 = vpow2.f32 %v190_v40  ;;  %v187_v42 = vmax.f32 %v185_v39, %v186_v41  ;;  %v2501_v39 = vld [vmem:[#allocation9 + $0x64] sm:$0xf]  ;;  %v1862_v40 = vld [vmem:[#allocation9 + $0x70] sm:$0xf0]  ;;  %v2506_v41 = vld [vmem:[#allocation9 + $0x8c] sm:$0xf]  ;;  %498 = vmatpush.bf16.msra.mxu2 %v1901_v38 }
  0xb3   :  { %v1865_v57 = vor.u32 %v2501_v39, %v1862_v40  ;;  %v2495_v38 = vld [vmem:[#allocation9 + $0x2c] sm:$0xf0]  ;;  %v1836_v39 = vld [vmem:[#allocation9 + $0x28] sm:$0xf]  ;;  %v2496_v40 = vld [vmem:[#allocation9 + $0x34] sm:$0xf0] }
  0xb4   :  { %v189_v43 = vsub.f32 %v172_v29, %v187_v42  ;;  %v1902_v29 = vld [vmem:[#allocation9 + $0xb8] sm:$0xf0]  ;;  %472 = vmatpush.bf16.msra.mxu0 %v1893_v37  ;;  %v1833_v37 = vor.u32 %v2493_v22, %v1830_v23  ;;  %v2036_v22 = vld [vmem:[#allocation11 + $0xc0] sm:$0xf]  ;;  %v2547_v23 = vld [vmem:[#allocation11 + $0xcc] sm:$0xf0] }
  0xb5   :  { %v1905_v31 = vor.u32 %v2510_v27, %v1902_v29  ;;  %487 = vmatpush.bf16.msra.mxu1 %v1865_v57  ;;  %v2494_v27 = vld [vmem:[#allocation9 + $0x2c] sm:$0xf] }
  0xb6   :  { %v192_v44 = vmul.f32 1.442695, %v189_v43  ;;  %v1886_v43 = vld [vmem:[#allocation9 + $0x98] sm:$0xf0] }
  0xb7   :  { %511 = vmatpush.bf16.msra.mxu3 %v1905_v31  ;;  %v1853_v31 = vor.u32 %v2500_v24, %v1852_v20  ;;  %v2575_v20 = vld [vmem:[#allocation11 + $0x1ac] sm:$0xf0]  ;;  %v2545_v24 = vld [vmem:[#allocation11 + $0xc4] sm:$0xf] }
  0xb8   :  { %v3034_v45 = vpop.eup %2682  ;;  %2684 = vpow2.f32 %v192_v44  ;;  %v1876_v44 = vld [vmem:[#allocation9 + $0x80] sm:$0xf] }
  0xb9   :  { %v194_v46 = vsel %vm140_vm1, %v3034_v45, 0.0 }
  0xba   :  { %v195_v47 = vrot.slane %v194_v46, 4 }
  0xbc   :  { %v196_v48 = vadd.f32 %v195_v47, %v194_v46  ;;  %v2507_v46 = vld [vmem:[#allocation9 + $0x8c] sm:$0xf0] }
  0xbd   :  { %v1877_v54 = vor.u32 %v2507_v46, %v1876_v44  ;;  %v1814_v44 = vld [vmem:[#allocation9 + $0x10] sm:$0xf0]  ;;  %v1841_v46 = vor.u32 %v2494_v27, %v1838_v33  ;;  %v2020_v33 = vld [vmem:[#allocation11 + $0xa0] sm:$0xf] }
  0xbe   :  { %v3038_v49 = vpop.eup %2684  ;;  %v197_v50 = vrot.slane %v196_v48, 2  ;;  %v1817_v57 = vor.u32 %v2489_v32, %v1814_v44  ;;  %v2150_v32 = vld [vmem:[#allocation11 + $0x1b0] sm:$0xf0] }
  0xbf   :  { %v201_v51 = vsel %vm140_vm1, %v3038_v49, 0.0  ;;  %473 = vmatpush.bf16.msra.mxu0 %v1877_v54  ;;  %v1812_v54 = vld [vmem:[#allocation9] sm:$0xf]  ;;  %v2134_v44 = vld [vmem:[#allocation11 + $0x190] sm:$0xf0] }
  0xc0   :  { %v198_v52 = vadd.f32 %v197_v50, %v196_v48  ;;  %v202_v53 = vrot.slane %v201_v51, 4  ;;  %v1884_v48 = vld [vmem:[#allocation9 + $0x88] sm:$0xf]  ;;  %v2508_v50 = vld [vmem:[#allocation9 + $0x94] sm:$0xf0] }
  0xc1   :  { %v1885_v58 = vor.u32 %v2508_v50, %v1884_v48  ;;  %v2490_v48 = vld [vmem:[#allocation9 + $0xc] sm:$0xf]  ;;  %v1822_v50 = vld [vmem:[#allocation9 + $0x18] sm:$0xf0] }
  0xc2   :  { %v199_v60 = vrot.slane %v198_v52, 1  ;;  %v203_v61 = vadd.f32 %v202_v53, %v201_v51  ;;  %v1889_v53 = vor.u32 %v2506_v41, %v1886_v43  ;;  %v1825_v5 = vor.u32 %v2490_v48, %v1822_v50  ;;  %v2569_v43 = vld [vmem:[#allocation11 + $0x184] sm:$0xf] }
  0xc3   :  { %499 = vmatpush.bf16.msra.mxu2 %v1885_v58  ;;  %474 = vmatpush.bf16.msra.mxu0 %v1861_v12  ;;  %v2492_v58 = vld [vmem:[#allocation9 + $0x14] sm:$0xf0]  ;;  %v2537_v50 = vld [vmem:[#allocation11 + $0x84] sm:$0xf] }
  0xc4   :  { %v3042_v8 = vadd.f32 %v199_v60, %v198_v52  ;;  %v204_v9 = vrot.slane %v203_v61, 2  ;;  %v1870_v60 = vld [vmem:[#allocation9 + $0x78] sm:$0xf0]  ;;  %512 = vmatpush.bf16.msra.mxu3 %v1889_v53  ;;  %v1837_v53 = vor.u32 %v2496_v40, %v1836_v39  ;;  %v2022_v39 = vld [vmem:[#allocation11 + $0xb0] sm:$0xf0] }
  0xc5   :  { %v1873_v4 = vor.u32 %v2502_v59, %v1870_v60  ;;  %v2164_v59 = vld [vmem:[#allocation11 + $0x1c0] sm:$0xf]  ;;  %v2581_v60 = vld [vmem:[#allocation11 + $0x1e4] sm:$0xf] }
  0xc6   :  { %2686 = vrcp.f32 %v3042_v8  ;;  %v205_v18 = vadd.f32 %v204_v9, %v203_v61  ;;  %v217_v51 = vand.u32 2147483647, %v3042_v8  ;;  %v219_v52 = vand.u32 2147483648, %v3042_v8  ;;  %v1846_v61 = vld [vmem:[#allocation9 + $0x50] sm:$0xf0] }
  0xc7   :  { %vm213_vm3 = vweird.f32 %v3042_v8  ;;  %v1849_v17 = vor.u32 %v2497_v55, %v1846_v61  ;;  %500 = vmatpush.bf16.msra.mxu2 %v1869_v13  ;;  %v2491_v55 = vld [vmem:[#allocation9 + $0xc] sm:$0xf0]  ;;  %v2549_v9 = vld [vmem:[#allocation11 + $0xe4] sm:$0xf] }
  0xc8   :  { %v206_v28 = vrot.slane %v205_v18, 1  ;;  %v220_v10 = vor.u32 1.1754944e-38, %v219_v52  ;;  %vm218_vm5 = vcmp.eq.f32.partialorder %v217_v51, 8.507059e+37  ;;  %513 = vmatpush.bf16.msra.mxu3 %v1873_v4  ;;  %v1829_v52 = vor.u32 %v2495_v38, %v1828_v34  ;;  %v2543_v34 = vld [vmem:[#allocation11 + $0xac] sm:$0xf0] }
  0xc9   :  { %488 = vmatpush.bf16.msra.mxu1 %v1849_v17  ;;  %v1813_v12 = vor.u32 %v2491_v55, %v1812_v54  ;;  %v2577_v17 = vld [vmem:[#allocation11 + $0x1c4] sm:$0xf]  ;;  %v2100_v54 = vld [vmem:[#allocation11 + $0x140] sm:$0xf]  ;;  %v2563_v55 = vld [vmem:[#allocation11 + $0x14c] sm:$0xf0] }
  0xca   :  { %v3045_v35 = vadd.f32 %v206_v28, %v205_v18  ;;  %v1844_v18 = vld [vmem:[#allocation9 + $0x40] sm:$0xf]  ;;  %v2541_v38 = vld [vmem:[#allocation11 + $0xa4] sm:$0xf] }
  0xcb   :  { %v1845_v30 = vor.u32 %v2499_v19, %v1844_v18  ;;  %501 = vmatpush.bf16.msra.mxu2 %v1853_v31  ;;  %v2166_v18 = vld [vmem:[#allocation11 + $0x1d0] sm:$0xf0]  ;;  %v2148_v19 = vld [vmem:[#allocation11 + $0x1a0] sm:$0xf]  ;;  %v2025_v40 = vor.u32 %v2541_v38, %v2022_v39  ;;  %v2523_v38 = vld [vmem:[#allocation11 + $0xc] sm:$0xf0] }
  0xcc   :  { %v2687_v42 = vpop.eup %2686  ;;  %2688 = vrcp.f32 %v3045_v35  ;;  %v232_v2 = vand.u32 2147483647, %v3045_v35  ;;  %v234_v11 = vand.u32 2147483648, %v3045_v35  ;;  %vm228_vm7 = vweird.f32 %v3045_v35  ;;  %v2521_v39 = vld [vmem:[#allocation11 + $0x4] sm:$0xf] }
  0xcd   :  { %v209_v47 = vmul.f32 %v2687_v42, %v3042_v8  ;;  %vm214_vm2 = vweird.f32 %v2687_v42  ;;  %v1854_v8 = vld [vmem:[#allocation9 + $0x58] sm:$0xf0]  ;;  %475 = vmatpush.bf16.msra.mxu0 %v1845_v30  ;;  %489 = vmatpush.bf16.msra.mxu1 %v1833_v37  ;;  %v2573_v30 = vld [vmem:[#allocation11 + $0x1a4] sm:$0xf]  ;;  %v2021_v37 = vor.u32 %v2543_v34, %v2020_v33  ;;  %v2070_v34 = vld [vmem:[#allocation11 + $0x110] sm:$0xf0] }
  0xce   :  { %vm3054_vm4 = vmor %vm213_vm3, %vm214_vm2  ;;  %v1857_v26 = vor.u32 %v2498_v14, %v1854_v8  ;;  %vm3075_vm9 = vcmp.eq.f32.partialorder %v232_v2, 8.507059e+37  ;;  %v2551_v2 = vld [vmem:[#allocation11 + $0xec] sm:$0xf0]  ;;  %v2185_v14 = vor.u32 %v2581_v60, %v2182_v63  ;;  %v2533_v63 = vld [vmem:[#allocation11 + $0x64] sm:$0xf] }
  0xcf   :  { %v210_v56 = vsub.f32 1.0, %v209_v47  ;;  %v2583_v47 = vld [vmem:[#allocation11 + $0x1ec] sm:$0xf0]  ;;  %502 = vmatpush.bf16.msra.mxu2 %v1837_v53  ;;  %v2553_v33 = vld [vmem:[#allocation11 + $0x104] sm:$0xf] }
  0xd0   :  { %514 = vmatpush.bf16.msra.mxu3 %v1857_v26  ;;  %v2038_v26 = vld [vmem:[#allocation11 + $0xd0] sm:$0xf0]  ;;  %v2535_v60 = vld [vmem:[#allocation11 + $0x6c] sm:$0xf0] }
  0xd1   :  { %v211_v0 = vmul.f32 %v2687_v42, %v210_v56  ;;  %v1820_v56 = vld [vmem:[#allocation9 + $0x8] sm:$0xf]  ;;  %476 = vmatpush.bf16.msra.mxu0 %v1829_v52  ;;  %490 = vmatpush.bf16.msra.mxu1 %v1817_v57  ;;  %v2041_v27 = vor.u32 %v2545_v24, %v2038_v26  ;;  %v2101_v57 = vor.u32 %v2563_v55, %v2100_v54  ;;  %v2527_v24 = vld [vmem:[#allocation11 + $0x2c] sm:$0xf0] }
  0xd2   :  { %v3059_v15 = vpop.eup %2688  ;;  %v1821_v13 = vor.u32 %v2492_v58, %v1820_v56  ;;  %v120_v52 = vld [vmem:[%s3162_s2] sm:$0x3]  ;;  %v2118_v58 = vld [vmem:[#allocation11 + $0x170] sm:$0xf0] }
  0xd3   :  { %v212_v16 = vadd.f32 %v2687_v42, %v211_v0  ;;  %v224_v21 = vmul.f32 %v3059_v15, %v3045_v35  ;;  %vm229_vm6 = vweird.f32 %v3059_v15  ;;  %v2180_v35 = vld [vmem:[#allocation11 + $0x1e0] sm:$0xf]  ;;  %122 = vst [vmem:[#allocation3] sm:$0x3] %v120_v52  ;;  %v2565_v56 = vld [vmem:[#allocation11 + $0x164] sm:$0xf] }
  0xd4   :  { %vm3071_vm8 = vmor %vm228_vm7, %vm229_vm6  ;;  %v2181_v62 = vor.u32 %v2583_v47, %v2180_v35  ;;  %v2052_v0 = vld [vmem:[#allocation11 + $0xe0] sm:$0xf]  ;;  %515 = vmatpush.bf16.msra.mxu3 %v1841_v46  ;;  %503 = vmatpush.bf16.msra.mxu2 %v1821_v13  ;;  %v2539_v46 = vld [vmem:[#allocation11 + $0x8c] sm:$0xf0]  ;;  %v2137_v47 = vor.u32 %v2569_v43, %v2134_v44 }
  0xd5   :  { %v216_v25 = vsel %vm3054_vm4, %v2687_v42, %v212_v16  ;;  %v225_v29 = vsub.f32 1.0, %v224_v21  ;;  %v2053_v8 = vor.u32 %v2551_v2, %v2052_v0  ;;  %477 = vmatpush.bf16.msra.mxu0 %v1813_v12  ;;  %v2149_v21 = vor.u32 %v2575_v20, %v2148_v19  ;;  %v2567_v42 = vld [vmem:[#allocation11 + $0x16c] sm:$0xf0]  ;;  %v2004_v35 = vld [vmem:[#allocation11 + $0x80] sm:$0xf] }
  0xd6   :  { %v221_v28 = vsel %vm218_vm5, %v220_v10, %v216_v25  ;;  %v2054_v10 = vld [vmem:[#allocation11 + $0xf0] sm:$0xf0]  ;;  %919 = vmatpush.bf16.msrb.mxu1 %v2181_v62  ;;  %v2037_v25 = vor.u32 %v2547_v23, %v2036_v22  ;;  %v2005_v48 = vor.u32 %v2539_v46, %v2004_v35  ;;  %v2531_v12 = vld [vmem:[#allocation11 + $0x4c] sm:$0xf0]  ;;  %v2068_v19 = vld [vmem:[#allocation11 + $0x100] sm:$0xf] }
  0xd7   :  { %v222_v36 = vmul.f32 %v3034_v45, %v221_v28  ;;  %v226_v41 = vmul.f32 %v3059_v15, %v225_v29  ;;  %v235_v45 = vor.u32 1.1754944e-38, %v234_v11  ;;  %v2057_v16 = vor.u32 %v2549_v9, %v2054_v10  ;;  %v2132_v28 = vld [vmem:[#allocation11 + $0x180] sm:$0xf]  ;;  %v2571_v29 = vld [vmem:[#allocation11 + $0x18c] sm:$0xf0] }
  0xd8   :  { %516 = vmatpush.bf16.msra.mxu3 %v1825_v5  ;;  %v2133_v31 = vor.u32 %v2571_v29, %v2132_v28  ;;  %v1990_v0 = vld [vmem:[#allocation11 + $0x70] sm:$0xf0]  ;;  %v2559_v5 = vld [vmem:[#allocation11 + $0x12c] sm:$0xf0]  ;;  %v1956_v23 = vld [vmem:[#allocation11 + $0x20] sm:$0xf] }
  0xd9   :  { %242 = vperm.xlu1 %2675, %v222_v36   ;;  %v227_v51 = vadd.f32 %v3059_v15, %v226_v41  ;;  %906 = vmatpush.bf16.msrb.mxu0 %v2053_v8  ;;  %v2153_v36 = vor.u32 %v2573_v30, %v2150_v32  ;;  %v2116_v41 = vld [vmem:[#allocation11 + $0x160] sm:$0xf]  ;;  %v1993_v2 = vor.u32 %v2533_v63, %v1990_v0  ;;  %v2102_v10 = vld [vmem:[#allocation11 + $0x150] sm:$0xf0]  ;;  %v2555_v20 = vld [vmem:[#allocation11 + $0x10c] sm:$0xf0] }
  0xda   :  { %932 = vmatpush.bf16.msrb.mxu2 %v2057_v16  ;;  %v1974_v16 = vld [vmem:[#allocation11 + $0x50] sm:$0xf0]  ;;  %v1957_v26 = vor.u32 %v2527_v24, %v1956_v23  ;;  %v2188_v29 = vld [vmem:[#allocation11 + $0x1e8] sm:$0xf]  ;;  %v2580_v43 = vld [vmem:[#allocation11 + $0x1d4] sm:$0xf0] }
  0xdb   :  { %v231_v61 = vsel %vm3071_vm8, %v3059_v15, %v227_v51  ;;  %v2165_v15 = vor.u32 %v2579_v7, %v2164_v59  ;;  %v2006_v51 = vld [vmem:[#allocation11 + $0x90] sm:$0xf0]  ;;  %v1988_v59 = vld [vmem:[#allocation11 + $0x60] sm:$0xf]  ;;  %v2561_v7 = vld [vmem:[#allocation11 + $0x144] sm:$0xf] }
  0xdc   :  { %v236_v4 = vsel %vm3075_vm9, %v235_v45, %v231_v61  ;;  %945 = vmatpush.bf16.msrb.mxu3 %v2185_v14  ;;  %v2117_v45 = vor.u32 %v2567_v42, %v2116_v41  ;;  %v2009_v53 = vor.u32 %v2537_v50, %v2006_v51  ;;  %v2121_v61 = vor.u32 %v2565_v56, %v2118_v58  ;;  %v143_v14 = vld [vmem:[#allocation3] sm:$0x3]  ;;  %v2172_v42 = vld [vmem:[#allocation11 + $0x1c8] sm:$0xf]  ;;  %v2582_v35 = vld [vmem:[#allocation11 + $0x1ec] sm:$0xf] }
  0xdd   :  { %v237_v11 = vmul.f32 %v3038_v49, %v236_v4  ;;  %v2169_v49 = vor.u32 %v2577_v17, %v2166_v18  ;;  %920 = vmatpush.bf16.msrb.mxu1 %v2165_v15  ;;  %907 = vmatpush.bf16.msrb.mxu0 %v2037_v25  ;;  %v1989_v62 = vor.u32 %v2535_v60, %v1988_v59  ;;  %v2084_v4 = vld [vmem:[#allocation11 + $0x120] sm:$0xf]  ;;  %v2529_v15 = vld [vmem:[#allocation11 + $0x44] sm:$0xf]  ;;  %v2086_v22 = vld [vmem:[#allocation11 + $0x130] sm:$0xf0] }
  0xde   :  { %933 = vmatpush.bf16.msrb.mxu2 %v2041_v27  ;;  %v2085_v9 = vor.u32 %v2559_v5, %v2084_v4  ;;  %v2105_v13 = vor.u32 %v2561_v7, %v2102_v10  ;;  %v277_v17 = vpack.c.bf16 %v143_v14, %v143_v14  ;;  %v1977_v18 = vor.u32 %v2529_v15, %v1974_v16  ;;  %v2525_v27 = vld [vmem:[#allocation11 + $0x24] sm:$0xf]  ;;  %v1958_v28 = vld [vmem:[#allocation11 + $0x30] sm:$0xf0]  ;;  %v2190_v46 = vld [vmem:[#allocation11 + $0x1f8] sm:$0xf0] }
  0xdf   :  { %247 = vperm.xlu2 %2676, %v237_v11   ;;  %v1972_v11 = vld [vmem:[#allocation11 + $0x40] sm:$0xf]  ;;  %v1961_v30 = vor.u32 %v2525_v27, %v1958_v28  ;;  %v1942_v41 = vld [vmem:[#allocation11 + $0x10] sm:$0xf0]  ;;  %v2173_v44 = vor.u32 %v2580_v43, %v2172_v42  ;;  %v2552_v50 = vld [vmem:[#allocation11 + $0xf4] sm:$0xf0] }
  0xe0   :  { %946 = vmatpush.bf16.msrb.mxu3 %v2169_v49  ;;  %v1973_v8 = vor.u32 %v2531_v12, %v1972_v11  ;;  %v2557_v49 = vld [vmem:[#allocation11 + $0x124] sm:$0xf]  ;;  %504 = vmatmul.bf16.vlgmr.msra.gmra.mxu2 %v277_v17  ;;  %v2550_v51 = vld [vmem:[#allocation11 + $0xec] sm:$0xf]  ;;  %v2062_v52 = vld [vmem:[#allocation11 + $0xf8] sm:$0xf0] }
  0xe1   :  { %921 = vmatpush.bf16.msrb.mxu1 %v2149_v21  ;;  %908 = vmatpush.bf16.msrb.mxu0 %v2021_v37  ;;  %v2069_v21 = vor.u32 %v2555_v20, %v2068_v19  ;;  %v2089_v25 = vor.u32 %v2557_v49, %v2086_v22  ;;  %v1940_v37 = vld [vmem:[#allocation11] sm:$0xf]  ;;  %v2065_v54 = vor.u32 %v2550_v51, %v2062_v52  ;;  %v2156_v55 = vld [vmem:[#allocation11 + $0x1a8] sm:$0xf]  ;;  %v2576_v56 = vld [vmem:[#allocation11 + $0x1b4] sm:$0xf0] }
  0xe2   :  { %934 = vmatpush.bf16.msrb.mxu2 %v2025_v40  ;;  %478 = vmatmul.bf16.vlgmr.msra.gmra.mxu0 %v277_v17  ;;  %v1941_v40 = vor.u32 %v2523_v38, %v1940_v37  ;;  %v2157_v58 = vor.u32 %v2576_v56, %v2156_v55  ;;  %v2174_v59 = vld [vmem:[#allocation11 + $0x1d8] sm:$0xf0]  ;;  %v2044_v60 = vld [vmem:[#allocation11 + $0xc8] sm:$0xf]  ;;  %v2546_v0 = vld [vmem:[#allocation11 + $0xcc] sm:$0xf] }
  0xe3   :  { %517 = vmatmul.bf16.vlgmr.msra.gmra.mxu3 %v277_v17  ;;  %491 = vmatmul.bf16.vlgmr.msra.gmra.mxu1 %v277_v17  ;;  %v2140_v5 = vld [vmem:[#allocation11 + $0x188] sm:$0xf]  ;;  %v2572_v7 = vld [vmem:[#allocation11 + $0x194] sm:$0xf0]  ;;  %v2158_v12 = vld [vmem:[#allocation11 + $0x1b8] sm:$0xf0] }
  0xe4   :  { %947 = vmatpush.bf16.msrb.mxu3 %v2153_v36  ;;  %v2073_v36 = vor.u32 %v2553_v33, %v2070_v34  ;;  %v2141_v11 = vor.u32 %v2572_v7, %v2140_v5  ;;  %v2544_v14 = vld [vmem:[#allocation11 + $0xb4] sm:$0xf0]  ;;  %v2542_v17 = vld [vmem:[#allocation11 + $0xac] sm:$0xf]  ;;  %v3094_v49 = vld [vmem:[%s3160_s0] sm:$0x1] }
  0xe5   :  { %922 = vmatpush.bf16.msrb.mxu1 %v2133_v31  ;;  %909 = vmatpush.bf16.msrb.mxu0 %v2005_v48  ;;  %v2584_v31 = vld [vmem:[#allocation11 + $0x1f4] sm:$0xf0]  ;;  %v2193_v48 = vor.u32 %v2582_v35, %v2190_v46  ;;  %v2142_v23 = vld [vmem:[#allocation11 + $0x198] sm:$0xf0]  ;;  %v2538_v28 = vld [vmem:[#allocation11 + $0x8c] sm:$0xf] }
  0xe6   :  { %935 = vmatpush.bf16.msrb.mxu2 %v2009_v53  ;;  %v2189_v32 = vor.u32 %v2584_v31, %v2188_v29  ;;  %v2568_v22 = vld [vmem:[#allocation11 + $0x174] sm:$0xf0]  ;;  %v2108_v33 = vld [vmem:[#allocation11 + $0x148] sm:$0xf]  ;;  %v2566_v37 = vld [vmem:[#allocation11 + $0x16c] sm:$0xf] }
  0xe7   :  { %v2540_v27 = vld [vmem:[#allocation11 + $0x94] sm:$0xf0]  ;;  %v2126_v38 = vld [vmem:[#allocation11 + $0x178] sm:$0xf0]  ;;  %v2534_v42 = vld [vmem:[#allocation11 + $0x6c] sm:$0xf] }
  0xe8   :  { %948 = vmatpush.bf16.msrb.mxu3 %v2137_v47  ;;  %v2060_v47 = vld [vmem:[#allocation11 + $0xe8] sm:$0xf]  ;;  %v2564_v34 = vld [vmem:[#allocation11 + $0x154] sm:$0xf0]  ;;  %v1998_v43 = vld [vmem:[#allocation11 + $0x78] sm:$0xf0] }
  0xe9   :  { %923 = vmatpush.bf16.msrb.mxu1 %v2117_v45  ;;  %910 = vmatpush.bf16.msrb.mxu0 %v1989_v62  ;;  %v1945_v45 = vor.u32 %v2521_v39, %v1942_v41  ;;  %v2061_v53 = vor.u32 %v2552_v50, %v2060_v47  ;;  %v1996_v39 = vld [vmem:[#allocation11 + $0x68] sm:$0xf]  ;;  %v2536_v41 = vld [vmem:[#allocation11 + $0x74] sm:$0xf0]  ;;  %v2562_v47 = vld [vmem:[#allocation11 + $0x14c] sm:$0xf] }
  0xea   :  { %936 = vmatpush.bf16.msrb.mxu2 %v1993_v2  ;;  %v2046_v2 = vld [vmem:[#allocation11 + $0xd8] sm:$0xf0]  ;;  %v2092_v35 = vld [vmem:[#allocation11 + $0x128] sm:$0xf]  ;;  %v2560_v46 = vld [vmem:[#allocation11 + $0x134] sm:$0xf0] }
  0xeb   :  { %v2049_v4 = vor.u32 %v2546_v0, %v2046_v2  ;;  %v2110_v50 = vld [vmem:[#allocation11 + $0x158] sm:$0xf0]  ;;  %v1980_v51 = vld [vmem:[#allocation11 + $0x48] sm:$0xf]  ;;  %v2093_v52 = vor.u32 %v2560_v46, %v2092_v35  ;;  %v2528_v0 = vld [vmem:[#allocation11 + $0x34] sm:$0xf0] }
  0xec   :  { %949 = vmatpush.bf16.msrb.mxu3 %v2121_v61  ;;  %v2548_v61 = vld [vmem:[#allocation11 + $0xd4] sm:$0xf0]  ;;  %v1982_v55 = vld [vmem:[#allocation11 + $0x58] sm:$0xf0]  ;;  %v2113_v56 = vor.u32 %v2562_v47, %v2110_v50  ;;  %v2526_v2 = vld [vmem:[#allocation11 + $0x2c] sm:$0xf] }
  0xed   :  { %924 = vmatpush.bf16.msrb.mxu1 %v2101_v57  ;;  %911 = vmatpush.bf16.msrb.mxu0 %v1973_v8  ;;  %v2578_v57 = vld [vmem:[#allocation11 + $0x1cc] sm:$0xf]  ;;  %v2045_v63 = vor.u32 %v2548_v61, %v2044_v60 }
  0xee   :  { %937 = vmatpush.bf16.msrb.mxu2 %v1977_v18  ;;  %v2177_v62 = vor.u32 %v2578_v57, %v2174_v59  ;;  %v2030_v18 = vld [vmem:[#allocation11 + $0xb8] sm:$0xf0]  ;;  %v2556_v59 = vld [vmem:[#allocation11 + $0x114] sm:$0xf0]  ;;  %v2558_v60 = vld [vmem:[#allocation11 + $0x12c] sm:$0xf] }
  0xef   :  { %v2033_v19 = vor.u32 %v2542_v17, %v2030_v18  ;;  %v2522_v17 = vld [vmem:[#allocation11 + $0xc] sm:$0xf]  ;;  %v1950_v18 = vld [vmem:[#allocation11 + $0x18] sm:$0xf0] }
  0xf0   :  { %950 = vmatpush.bf16.msrb.mxu3 %v2105_v13  ;;  %v2028_v13 = vld [vmem:[#allocation11 + $0xa8] sm:$0xf] }
  0xf1   :  { %925 = vmatpush.bf16.msrb.mxu1 %v2085_v9  ;;  %912 = vmatpush.bf16.msrb.mxu0 %v1957_v26  ;;  %v2574_v9 = vld [vmem:[#allocation11 + $0x1ac] sm:$0xf]  ;;  %v2029_v16 = vor.u32 %v2544_v14, %v2028_v13  ;;  %v2012_v26 = vld [vmem:[#allocation11 + $0x88] sm:$0xf] }
  0xf2   :  { %938 = vmatpush.bf16.msrb.mxu2 %v1961_v30  ;;  %v2161_v15 = vor.u32 %v2574_v9, %v2158_v12  ;;  %v2013_v29 = vor.u32 %v2540_v27, %v2012_v26  ;;  %v2014_v30 = vld [vmem:[#allocation11 + $0x98] sm:$0xf0]  ;;  %v2554_v12 = vld [vmem:[#allocation11 + $0x10c] sm:$0xf] }
  0xf4   :  { %951 = vmatpush.bf16.msrb.mxu3 %v2089_v25 }
  0xf5   :  { %926 = vmatpush.bf16.msrb.mxu1 %v2069_v21  ;;  %913 = vmatpush.bf16.msrb.mxu0 %v1941_v40  ;;  %v2124_v21 = vld [vmem:[#allocation11 + $0x168] sm:$0xf]  ;;  %v2129_v40 = vor.u32 %v2566_v37, %v2126_v38  ;;  %v2615_v37 = vld [vmem:[#allocation9 + $0x1ec] sm:$0xf0]  ;;  %v2613_v38 = vld [vmem:[#allocation9 + $0x1e4] sm:$0xf] }
  0xf6   :  { %939 = vmatpush.bf16.msrb.mxu2 %v1945_v45  ;;  %v2125_v24 = vor.u32 %v2568_v22, %v2124_v21  ;;  %v1997_v45 = vor.u32 %v2536_v41, %v1996_v39  ;;  %v2319_v41 = vld [vmem:[#allocation9 + $0x1e8] sm:$0xf] }
  0xf8   :  { %952 = vmatpush.bf16.msrb.mxu3 %v2073_v36  ;;  %927 = vmatmul.bf16.vlgmr.msrb.gmra.mxu1 %v3094_v49  ;;  %v2109_v36 = vor.u32 %v2564_v34, %v2108_v33 }
  0xf9   :  { %971 = vmatpush.bf16.msra.mxu1 %v2189_v32  ;;  %958 = vmatpush.bf16.msra.mxu0 %v2061_v53  ;;  %v2017_v32 = vor.u32 %v2538_v28, %v2014_v30  ;;  %v2532_v53 = vld [vmem:[#allocation11 + $0x54] sm:$0xf0] }
  0xfa   :  { %984 = vmatpush.bf16.msra.mxu2 %v2065_v54  ;;  %v2530_v54 = vld [vmem:[#allocation11 + $0x4c] sm:$0xf]  ;;  %v1981_v57 = vor.u32 %v2532_v53, %v1980_v51 }
  0xfb   :  { %953 = vmatmul.bf16.vlgmr.msrb.gmra.mxu3 %v3094_v49  ;;  %v1985_v61 = vor.u32 %v2530_v54, %v1982_v55 }
  0xfc   :  { %997 = vmatpush.bf16.msra.mxu3 %v2193_v48 }
  0xfd   :  { %972 = vmatpush.bf16.msra.mxu1 %v2173_v44  ;;  %959 = vmatpush.bf16.msra.mxu0 %v2045_v63  ;;  %v2001_v44 = vor.u32 %v2534_v42, %v1998_v43  ;;  %v1964_v63 = vld [vmem:[#allocation11 + $0x28] sm:$0xf] }
  0xfe   :  { %985 = vmatpush.bf16.msra.mxu2 %v2049_v4  ;;  %v1966_v4 = vld [vmem:[#allocation11 + $0x38] sm:$0xf0] }
  0xff   :  { %v1969_v14 = vor.u32 %v2526_v2, %v1966_v4  ;;  %v2610_v2 = vld [vmem:[#allocation9 + $0x1cc] sm:$0xf]  ;;  %v2305_v4 = vld [vmem:[#allocation9 + $0x1d8] sm:$0xf0] }
 0x100   :  { %998 = vmatpush.bf16.msra.mxu3 %v2177_v62  ;;  %v2094_v62 = vld [vmem:[#allocation11 + $0x138] sm:$0xf0] }
 0x101   :  { %973 = vmatpush.bf16.msra.mxu1 %v2157_v58  ;;  %960 = vmatpush.bf16.msra.mxu0 %v2029_v16  ;;  %v2076_v58 = vld [vmem:[#allocation11 + $0x108] sm:$0xf]  ;;  %v2524_v16 = vld [vmem:[#allocation11 + $0x14] sm:$0xf0] }
 0x102   :  { %986 = vmatpush.bf16.msra.mxu2 %v2033_v19  ;;  %v2077_v7 = vor.u32 %v2556_v59, %v2076_v58  ;;  %v2609_v58 = vld [vmem:[#allocation9 + $0x1c4] sm:$0xf] }
 0x104   :  { %999 = vmatpush.bf16.msra.mxu3 %v2161_v15  ;;  %v1948_v15 = vld [vmem:[#allocation11 + $0x8] sm:$0xf] }
 0x105   :  { %974 = vmatpush.bf16.msra.mxu1 %v2141_v11  ;;  %961 = vmatpush.bf16.msra.mxu0 %v2013_v29  ;;  %v1965_v11 = vor.u32 %v2528_v0, %v1964_v63  ;;  %v1949_v22 = vor.u32 %v2524_v16, %v1948_v15  ;;  %v2608_v15 = vld [vmem:[#allocation9 + $0x1b4] sm:$0xf0]  ;;  %v2606_v16 = vld [vmem:[#allocation9 + $0x1ac] sm:$0xf] }
 0x106   :  { %987 = vmatpush.bf16.msra.mxu2 %v2017_v32 }
 0x109   :  { %975 = vmatpush.bf16.msra.mxu1 %v2125_v24  ;;  %962 = vmatpush.bf16.msra.mxu0 %v1997_v45  ;;  %v2614_v45 = vld [vmem:[#allocation9 + $0x1ec] sm:$0xf] }
 0x10a   :  { %988 = vmatpush.bf16.msra.mxu2 %v2001_v44  ;;  %v2321_v44 = vld [vmem:[#allocation9 + $0x1f8] sm:$0xf0] }
 0x10b   :  { %v2324_v35 = vor.u32 %v2614_v45, %v2321_v44  ;;  %v2231_v45 = vld [vmem:[#allocation9 + $0x140] sm:$0xf]  ;;  %v2595_v44 = vld [vmem:[#allocation9 + $0x14c] sm:$0xf0] }
 0x10d   :  { %976 = vmatpush.bf16.msra.mxu1 %v2109_v36  ;;  %963 = vmatpush.bf16.msra.mxu0 %v1981_v57  ;;  %v2311_v36 = vld [vmem:[#allocation9 + $0x1e0] sm:$0xf]  ;;  %v2611_v57 = vld [vmem:[#allocation9 + $0x1cc] sm:$0xf0] }
 0x10e   :  { %989 = vmatpush.bf16.msra.mxu2 %v1985_v61  ;;  %v2312_v39 = vor.u32 %v2615_v37, %v2311_v36  ;;  %v2303_v61 = vld [vmem:[#allocation9 + $0x1c8] sm:$0xf]  ;;  %v2249_v36 = vld [vmem:[#allocation9 + $0x170] sm:$0xf0] }
 0x10f   :  { %v2255_v37 = vld [vmem:[#allocation9 + $0x168] sm:$0xf] }
 0x111   :  { %977 = vmatpush.bf16.msra.mxu1 %v2093_v52  ;;  %964 = vmatpush.bf16.msra.mxu0 %v1965_v11  ;;  %v2605_v11 = vld [vmem:[#allocation9 + $0x1a4] sm:$0xf] }
 0x112   :  { %990 = vmatpush.bf16.msra.mxu2 %v1969_v14  ;;  %v2287_v14 = vld [vmem:[#allocation9 + $0x1a8] sm:$0xf] }
 0x115   :  { %978 = vmatpush.bf16.msra.mxu1 %v2077_v7  ;;  %965 = vmatpush.bf16.msra.mxu0 %v1949_v22  ;;  %v2308_v7 = vor.u32 %v2610_v2, %v2305_v4  ;;  %v2603_v22 = vld [vmem:[#allocation9 + $0x18c] sm:$0xf0]  ;;  %v2217_v2 = vld [vmem:[#allocation9 + $0x130] sm:$0xf0]  ;;  %v2223_v4 = vld [vmem:[#allocation9 + $0x128] sm:$0xf] }
 0x118   :  { %979 = vmatmul.bf16.vlgmr.msra.gmra.mxu1 %v3094_v49 }
 0x139   :  { %v248_v10 = vpop.permute.xlu2 %247 }
 0x13a   :  { %v251_v8 = vmul.f32 %v2660_v6, %v248_v10  ;;  %v2570_v6 = vld [vmem:[#allocation11 + $0x18c] sm:$0xf]  ;;  %v2097_v10 = vor.u32 %v2558_v60, %v2094_v62  ;;  %v2297_v60 = vld [vmem:[#allocation9 + $0x1d0] sm:$0xf0]  ;;  %v2612_v62 = vld [vmem:[#allocation9 + $0x1d4] sm:$0xf0] }
 0x13b   :  { %v2145_v25 = vor.u32 %v2570_v6, %v2142_v23  ;;  %v1953_v23 = vor.u32 %v2522_v17, %v1950_v18  ;;  %v2300_v63 = vor.u32 %v2609_v58, %v2297_v60  ;;  %v2304_v0 = vor.u32 %v2612_v62, %v2303_v61  ;;  %v2594_v58 = vld [vmem:[#allocation9 + $0x14c] sm:$0xf]  ;;  %v2215_v61 = vld [vmem:[#allocation9 + $0x120] sm:$0xf]  ;;  %v2591_v62 = vld [vmem:[#allocation9 + $0x12c] sm:$0xf0] }
 0x13c   :  { %v258_v20 = vrot.slane %v251_v8, 4  ;;  %v2288_v18 = vor.u32 %v2608_v15, %v2287_v14  ;;  %v2587_v15 = vld [vmem:[#allocation9 + $0x10c] sm:$0xf0] }
 0x13d   :  { %1000 = vmatpush.bf16.msra.mxu3 %v2145_v25  ;;  %991 = vmatpush.bf16.msra.mxu2 %v1953_v23 }
 0x13e   :  { %v259_v31 = vadd.f32 %v258_v20, %v251_v8  ;;  %v2078_v8 = vld [vmem:[#allocation11 + $0x118] sm:$0xf0] }
 0x13f   :  { %v2081_v21 = vor.u32 %v2554_v12, %v2078_v8 }
 0x140   :  { %v260_v48 = vrot.slane %v259_v31, 2 }
 0x141   :  { %1001 = vmatpush.bf16.msra.mxu3 %v2129_v40  ;;  %v2313_v40 = vld [vmem:[#allocation9 + $0x1f0] sm:$0xf0] }
 0x142   :  { %v261_v5 = vadd.f32 %v260_v48, %v259_v31  ;;  %v2316_v42 = vor.u32 %v2613_v38, %v2313_v40  ;;  %v2598_v40 = vld [vmem:[#allocation9 + $0x16c] sm:$0xf] }
 0x144   :  { %v262_v19 = vrot.slane %v261_v5, 1  ;;  %1297 = vmatpush.bf16.msrb.mxu1 %v2316_v42 }
 0x145   :  { %1002 = vmatpush.bf16.msra.mxu3 %v2113_v56  ;;  %v2295_v56 = vld [vmem:[#allocation9 + $0x1c0] sm:$0xf] }
 0x146   :  { %v263_v1 = vadd.f32 %v262_v19, %v261_v5  ;;  %v2296_v59 = vor.u32 %v2611_v57, %v2295_v56  ;;  %v2289_v19 = vld [vmem:[#allocation9 + $0x1b8] sm:$0xf0] }
 0x148   :  { %v266_v25 = vpack.c.bf16 %v263_v1, %v263_v1  ;;  %1298 = vmatpush.bf16.msrb.mxu1 %v2300_v63  ;;  %v2265_v1 = vld [vmem:[#allocation9 + $0x190] sm:$0xf0]  ;;  %v2589_v63 = vld [vmem:[#allocation9 + $0x124] sm:$0xf] }
 0x149   :  { %1003 = vmatpush.bf16.msra.mxu3 %v2097_v10  ;;  %v2607_v10 = vld [vmem:[#allocation9 + $0x1ac] sm:$0xf0] }
 0x14a   :  { %v270_v28 = vperm.slane %v266_v25, 0 }
 0x14b   :  { %v243_v9 = vpop.permute.xlu1 %242 }
 0x14c   :  { %v250_v13 = vmul.f32 %v2659_v3, %v243_v9  ;;  %v272_v31 = vunpack.c.l.b16 %v270_v28  ;;  %v2279_v9 = vld [vmem:[#allocation9 + $0x1a0] sm:$0xf]  ;;  %v2273_v28 = vld [vmem:[#allocation9 + $0x198] sm:$0xf0] }
 0x14d   :  { %1004 = vmatpush.bf16.msra.mxu3 %v2081_v21  ;;  %v2280_v12 = vor.u32 %v2607_v10, %v2279_v9  ;;  %v2263_v21 = vld [vmem:[#allocation9 + $0x180] sm:$0xf]  ;;  %v2220_v9 = vor.u32 %v2589_v63, %v2217_v2  ;;  %v2409_v63 = vld [vmem:[#allocation12 + $0xb0] sm:$0xf0]  ;;  %v2640_v2 = vld [vmem:[#allocation12 + $0xb4] sm:$0xf0] }
 0x14e   :  { %v252_v20 = vrot.slane %v250_v13, 4  ;;  %v2264_v23 = vor.u32 %v2603_v22, %v2263_v21 }
 0x150   :  { %v253_v6 = vadd.f32 %v252_v20, %v250_v13  ;;  %1005 = vmatmul.bf16.vlgmr.msra.gmra.mxu3 %v3094_v49  ;;  %v2616_v49 = vld [vmem:[#allocation9 + $0x1f4] sm:$0xf0]  ;;  %v2281_v13 = vld [vmem:[#allocation9 + $0x1b0] sm:$0xf0]  ;;  %v2292_v20 = vor.u32 %v2606_v16, %v2289_v19  ;;  %v2585_v16 = vld [vmem:[#allocation9 + $0x104] sm:$0xf] }
 0x151   :  { %v2320_v43 = vor.u32 %v2616_v49, %v2319_v41  ;;  %1323 = vmatpush.bf16.msrb.mxu3 %v2324_v35  ;;  %v2284_v8 = vor.u32 %v2605_v11, %v2281_v13  ;;  %v2257_v41 = vld [vmem:[#allocation9 + $0x178] sm:$0xf0]  ;;  %v2593_v35 = vld [vmem:[#allocation9 + $0x144] sm:$0xf]  ;;  %v2590_v11 = vld [vmem:[#allocation9 + $0x12c] sm:$0xf] }
 0x152   :  { %v254_v3 = vrot.slane %v253_v6, 2  ;;  %v2260_v42 = vor.u32 %v2598_v40, %v2257_v41  ;;  %v2207_v19 = vld [vmem:[#allocation9 + $0x108] sm:$0xf]  ;;  %v2643_v41 = vld [vmem:[#allocation12 + $0xcc] sm:$0xf0] }
 0x153   :  { %1299 = vmatpush.bf16.msrb.mxu1 %v2284_v8  ;;  %v2199_v8 = vld [vmem:[#allocation9 + $0x100] sm:$0xf] }
 0x154   :  { %v255_v24 = vadd.f32 %v254_v3, %v253_v6  ;;  %v2601_v6 = vld [vmem:[#allocation9 + $0x184] sm:$0xf]  ;;  %v2271_v3 = vld [vmem:[#allocation9 + $0x188] sm:$0xf] }
 0x155   :  { %1324 = vmatpush.bf16.msrb.mxu3 %v2308_v7  ;;  %v2268_v25 = vor.u32 %v2601_v6, %v2265_v1  ;;  %v2592_v7 = vld [vmem:[#allocation9 + $0x134] sm:$0xf0]  ;;  %v2586_v6 = vld [vmem:[#allocation9 + $0x10c] sm:$0xf]  ;;  %v2439_v1 = vld [vmem:[#allocation12 + $0xe0] sm:$0xf] }
 0x156   :  { %v256_v26 = vrot.slane %v255_v24, 1  ;;  %v2224_v10 = vor.u32 %v2592_v7, %v2223_v4  ;;  %v124_v7 = vld [vmem:[%s3163_s3] sm:$0xf]  }
 0x157   :  { %1300 = vmatpush.bf16.msrb.mxu1 %v2268_v25  ;;  %v2647_v25 = vld [vmem:[#allocation12 + $0xec] sm:$0xf0]  ;;  %126 = vst [vmem:[#allocation4] sm:$0xf] %v124_v7   ;;  %v2351_v7 = vld [vmem:[#allocation12 + $0x28] sm:$0xf] }
 0x158   :  { %v257_v27 = vadd.f32 %v256_v26, %v255_v24  ;;  %v2604_v24 = vld [vmem:[#allocation9 + $0x194] sm:$0xf0] }
 0x159   :  { %1325 = vmatpush.bf16.msrb.mxu3 %v2292_v20  ;;  %v2272_v26 = vor.u32 %v2604_v24, %v2271_v3  ;;  %v2588_v20 = vld [vmem:[#allocation9 + $0x114] sm:$0xf0] }
 0x15a   :  { %v265_v29 = vpack.c.bf16 %v257_v27, %v257_v27  ;;  %v2602_v27 = vld [vmem:[#allocation9 + $0x18c] sm:$0xf]  ;;  %v2208_v22 = vor.u32 %v2588_v20, %v2207_v19  ;;  %v2399_v19 = vld [vmem:[#allocation12 + $0x88] sm:$0xf]  ;;  %v2636_v20 = vld [vmem:[#allocation12 + $0x94] sm:$0xf0] }
 0x15c   :  { %v269_v30 = vperm.slane %v265_v29, 0 }
 0x15e   :  { %v271_v32 = vunpack.c.l.b16 %v269_v30  ;;  %v2276_v30 = vor.u32 %v2602_v27, %v2273_v28  ;;  %v2441_v27 = vld [vmem:[#allocation12 + $0xf0] sm:$0xf0]  ;;  %v2722_v28 = vld [vmem:[#allocation3 + $0x2] sm:$0x3] }
 0x15f   :  { %v3102_v46 = vpop.f32.mrf.mxu0 }
 0x160   :  { %v274_v33 = vsel %vm273_vm10, %v272_v31, %v271_v32  ;;  %v3104_v47 = vpop.f32.mrf.mxu1  ;;  %v2247_v31 = vld [vmem:[#allocation9 + $0x160] sm:$0xf]  ;;  %v2599_v32 = vld [vmem:[#allocation9 + $0x16c] sm:$0xf0]  ;;  %1326 = vmatpush.bf16.msrb.mxu3 %v2276_v30  ;;  %v3121_v30 = vld [vmem:[%s3170_s10] sm:$0xf] }
 0x161   :  { %v275_v34 = vpack.c.b16 %v274_v33, %v274_v33  ;;  %v2248_v33 = vor.u32 %v2599_v32, %v2247_v31  ;;  %v2440_v31 = vor.u32 %v2647_v25, %v2439_v1  ;;  %v2401_v1 = vld [vmem:[#allocation12 + $0x98] sm:$0xf0]  ;;  %v1013_v25 = vperm.slane %v3121_v30, 1 }
 0x163   :  { %914 = vmatmul.bf16.vlgmr.msrb.gmra.mxu0 %v275_v34  ;;  %940 = vmatmul.bf16.vlgmr.msrb.gmra.mxu2 %v275_v34  ;;  %v3106_v48 = vpop.f32.mrf.mxu2 }
 0x164   :  { %1284 = vmatpush.bf16.msrb.mxu0 %v2312_v39  ;;  %1310 = vmatpush.bf16.msrb.mxu2 %v2320_v43  ;;  %v2600_v39 = vld [vmem:[#allocation9 + $0x174] sm:$0xf0] }
 0x165   :  { %v2256_v49 = vor.u32 %v2600_v39, %v2255_v37  ;;  %1327 = vmatpush.bf16.msrb.mxu3 %v2260_v42  ;;  %v2646_v37 = vld [vmem:[#allocation12 + $0xec] sm:$0xf]  ;;  %v2423_v39 = vld [vmem:[#allocation12 + $0xc0] sm:$0xf]  ;;  %v2425_v42 = vld [vmem:[#allocation12 + $0xd0] sm:$0xf0] }
 0x166   :  { %v3108_v50 = vpop.f32.mrf.mxu3 }
 0x167   :  { %v481_v51 = vpop.f32.mrf.mxu0 }
 0x168   :  { %v494_v52 = vpop.f32.mrf.mxu1  ;;  %1285 = vmatpush.bf16.msrb.mxu0 %v2296_v59  ;;  %1311 = vmatpush.bf16.msrb.mxu2 %v2304_v0  ;;  %v2232_v51 = vor.u32 %v2595_v44, %v2231_v45  ;;  %v2241_v59 = vld [vmem:[#allocation9 + $0x158] sm:$0xf0]  ;;  %v2216_v0 = vor.u32 %v2591_v62, %v2215_v61  ;;  %v2424_v45 = vor.u32 %v2643_v41, %v2423_v39  ;;  %v2632_v39 = vld [vmem:[#allocation12 + $0x74] sm:$0xf0] }
 0x169   :  { %v2233_v52 = vld [vmem:[#allocation9 + $0x150] sm:$0xf0]  ;;  %v2244_v60 = vor.u32 %v2594_v58, %v2241_v59  ;;  %v2407_v58 = vld [vmem:[#allocation12 + $0xa0] sm:$0xf]  ;;  %v2639_v59 = vld [vmem:[#allocation12 + $0xac] sm:$0xf0] }
 0x16a   :  { %v2236_v56 = vor.u32 %v2593_v35, %v2233_v52  ;;  %v2431_v35 = vld [vmem:[#allocation12 + $0xc8] sm:$0xf]  ;;  %v2642_v52 = vld [vmem:[#allocation12 + $0xcc] sm:$0xf]  ;;  %v2408_v62 = vor.u32 %v2639_v59, %v2407_v58  ;;  %v2369_v59 = vld [vmem:[#allocation12 + $0x58] sm:$0xf0] }
 0x16b   :  { %v507_v53 = vpop.f32.mrf.mxu2  ;;  %1328 = vmatpush.bf16.msrb.mxu3 %v2244_v60  ;;  %v2637_v60 = vld [vmem:[#allocation12 + $0xa4] sm:$0xf]  ;;  %v2626_v58 = vld [vmem:[#allocation12 + $0x4c] sm:$0xf] }
 0x16c   :  { %1286 = vmatpush.bf16.msrb.mxu0 %v2280_v12  ;;  %1312 = vmatpush.bf16.msrb.mxu2 %v2288_v18  ;;  %v2239_v53 = vld [vmem:[#allocation9 + $0x148] sm:$0xf]  ;;  %v2225_v12 = vld [vmem:[#allocation9 + $0x138] sm:$0xf0]  ;;  %v2201_v18 = vld [vmem:[#allocation9 + $0x110] sm:$0xf0] }
 0x16d   :  { %v2228_v13 = vor.u32 %v2590_v11, %v2225_v12  ;;  %v2204_v21 = vor.u32 %v2585_v16, %v2201_v18  ;;  %v2638_v12 = vld [vmem:[#allocation12 + $0xac] sm:$0xf]  ;;  %v2635_v16 = vld [vmem:[#allocation12 + $0x8c] sm:$0xf0]  ;;  %v2393_v18 = vld [vmem:[#allocation12 + $0x90] sm:$0xf0] }
 0x16e   :  { %v520_v54 = vpop.f32.mrf.mxu3 }
 0x16f   :  { %v2596_v54 = vld [vmem:[#allocation9 + $0x154] sm:$0xf0]  ;;  %1329 = vmatpush.bf16.msrb.mxu3 %v2228_v13  ;;  %v2417_v13 = vld [vmem:[#allocation12 + $0xb8] sm:$0xf0] }
 0x170   :  { %1287 = vmatpush.bf16.msrb.mxu0 %v2264_v23  ;;  %1313 = vmatpush.bf16.msrb.mxu2 %v2272_v26  ;;  %v2240_v57 = vor.u32 %v2596_v54, %v2239_v53  ;;  %v2209_v23 = vld [vmem:[#allocation9 + $0x118] sm:$0xf0]  ;;  %v2645_v26 = vld [vmem:[#allocation12 + $0xe4] sm:$0xf]  ;;  %v1012_v53 = vperm.slane %v3121_v30, 0 }
 0x171   :  { %v2212_v24 = vor.u32 %v2586_v6, %v2209_v23  ;;  %v2444_v32 = vor.u32 %v2645_v26, %v2441_v27  ;;  %v2400_v6 = vor.u32 %v2636_v20, %v2399_v19  ;;  %v2634_v23 = vld [vmem:[#allocation12 + $0x8c] sm:$0xf]  ;;  %v2617_v20 = vld [vmem:[#allocation12 + $0x4] sm:$0xf] }
 0x173   :  { %966 = vmatmul.bf16.vlgmr.msra.gmra.mxu0 %v275_v34  ;;  %992 = vmatmul.bf16.vlgmr.msra.gmra.mxu2 %v275_v34  ;;  %v2597_v34 = vld [vmem:[#allocation9 + $0x164] sm:$0xf] }
 0x174   :  { %v2252_v38 = vor.u32 %v2597_v34, %v2249_v36  ;;  %1288 = vmatpush.bf16.msrb.mxu0 %v2248_v33  ;;  %1314 = vmatpush.bf16.msrb.mxu2 %v2256_v49  ;;  %v2447_v33 = vld [vmem:[#allocation12 + $0xe8] sm:$0xf]  ;;  %v2648_v34 = vld [vmem:[#allocation12 + $0xf4] sm:$0xf0]  ;;  %v2641_v49 = vld [vmem:[#allocation12 + $0xc4] sm:$0xf] }
 0x175   :  { %v3110_v55 = vpop.f32.mrf.mxu1  ;;  %v2448_v36 = vor.u32 %v2648_v34, %v2447_v33  ;;  %1330 = vmatpush.bf16.msrb.mxu3 %v2212_v24  ;;  %v2428_v44 = vor.u32 %v2641_v49, %v2425_v42  ;;  %v2629_v33 = vld [vmem:[#allocation12 + $0x64] sm:$0xf]  ;;  %v2377_v34 = vld [vmem:[#allocation12 + $0x70] sm:$0xf0]  ;;  %v2385_v49 = vld [vmem:[#allocation12 + $0x78] sm:$0xf0] }
 0x176   :  { %1301 = vmatpush.bf16.msrb.mxu1 %v2252_v38  ;;  %v2449_v38 = vld [vmem:[#allocation12 + $0xf8] sm:$0xf0] }
 0x177   :  { %v2452_v40 = vor.u32 %v2646_v37, %v2449_v38  ;;  %v2380_v38 = vor.u32 %v2629_v33, %v2377_v34  ;;  %v1015_v34 = vperm.slane %v3121_v30, 3 }
 0x178   :  { %1289 = vmatpush.bf16.msrb.mxu0 %v2232_v51  ;;  %1315 = vmatpush.bf16.msrb.mxu2 %v2240_v57  ;;  %v2644_v51 = vld [vmem:[#allocation12 + $0xd4] sm:$0xf0] }
 0x179   :  { %1567 = vmatpush.bf16.msra.mxu3 %v2452_v40  ;;  %v2432_v54 = vor.u32 %v2644_v51, %v2431_v35  ;;  %v2630_v40 = vld [vmem:[#allocation12 + $0x6c] sm:$0xf]  ;;  %v2625_v35 = vld [vmem:[#allocation12 + $0x44] sm:$0xf] }
 0x17a   :  { %1302 = vmatpush.bf16.msrb.mxu1 %v2236_v56  ;;  %v2433_v56 = vld [vmem:[#allocation12 + $0xd8] sm:$0xf0]  ;;  %v2388_v42 = vor.u32 %v2630_v40, %v2385_v49 }
 0x17b   :  { %v2436_v57 = vor.u32 %v2642_v52, %v2433_v56  ;;  %v2361_v52 = vld [vmem:[#allocation12 + $0x50] sm:$0xf0] }
 0x17c   :  { %1290 = vmatpush.bf16.msrb.mxu0 %v2216_v0  ;;  %1316 = vmatpush.bf16.msrb.mxu2 %v2224_v10  ;;  %v2415_v0 = vld [vmem:[#allocation12 + $0xa8] sm:$0xf]  ;;  %v2412_v10 = vor.u32 %v2637_v60, %v2409_v63  ;;  %v2623_v63 = vld [vmem:[#allocation12 + $0x2c] sm:$0xf0] }
 0x17d   :  { %v930_v17 = vpop.f32.mrf.mxu1  ;;  %v2416_v11 = vor.u32 %v2640_v2, %v2415_v0  ;;  %1568 = vmatpush.bf16.msra.mxu3 %v2436_v57  ;;  %v2621_v0 = vld [vmem:[#allocation12 + $0x24] sm:$0xf] }
 0x17e   :  { %v3112_v5 = vpop.f32.mrf.mxu3  ;;  %1303 = vmatpush.bf16.msrb.mxu1 %v2220_v9  ;;  %v2200_v17 = vor.u32 %v2587_v15, %v2199_v8  ;;  %v2391_v15 = vld [vmem:[#allocation12 + $0x80] sm:$0xf] }
 0x180   :  { %1291 = vmatpush.bf16.msrb.mxu0 %v2200_v17  ;;  %1317 = vmatpush.bf16.msrb.mxu2 %v2208_v22  ;;  %v2633_v17 = vld [vmem:[#allocation12 + $0x84] sm:$0xf] }
 0x181   :  { %v2396_v22 = vor.u32 %v2633_v17, %v2393_v18  ;;  %v2619_v18 = vld [vmem:[#allocation12 + $0xc] sm:$0xf0] }
 0x182   :  { %1304 = vmatpush.bf16.msrb.mxu1 %v2204_v21 }
 0x184   :  { %1528 = vmatpush.bf16.msra.mxu0 %v2440_v31  ;;  %1554 = vmatpush.bf16.msra.mxu2 %v2448_v36  ;;  %v2383_v36 = vld [vmem:[#allocation12 + $0x68] sm:$0xf] }
 0x185   :  { %v2384_v41 = vor.u32 %v2632_v39, %v2383_v36 }
 0x186   :  { %v956_v29 = vpop.f32.mrf.mxu3  ;;  %1541 = vmatpush.bf16.msra.mxu1 %v2444_v32 }
 0x187   :  { %v1090_v29 = vpack.c.bf16 %v2722_v28, %v2722_v28  ;;  %v2375_v28 = vld [vmem:[#allocation12 + $0x60] sm:$0xf] }
 0x188   :  { %1529 = vmatpush.bf16.msra.mxu0 %v2424_v45  ;;  %1555 = vmatpush.bf16.msra.mxu2 %v2432_v54  ;;  %v2359_v45 = vld [vmem:[#allocation12 + $0x40] sm:$0xf]  ;;  %v2628_v54 = vld [vmem:[#allocation12 + $0x54] sm:$0xf0] }
 0x189   :  { %1292 = vmatmul.bf16.vlgmr.msrb.gmra.mxu0 %v1090_v29  ;;  %1305 = vmatmul.bf16.vlgmr.msrb.gmra.mxu1 %v1090_v29 }
 0x18a   :  { %1318 = vmatmul.bf16.vlgmr.msrb.gmra.mxu2 %v1090_v29  ;;  %1331 = vmatmul.bf16.vlgmr.msrb.gmra.mxu3 %v1090_v29  ;;  %v2631_v29 = vld [vmem:[#allocation12 + $0x6c] sm:$0xf0] }
 0x18b   :  { %1542 = vmatpush.bf16.msra.mxu1 %v2428_v44  ;;  %v2376_v32 = vor.u32 %v2631_v29, %v2375_v28  ;;  %v2627_v44 = vld [vmem:[#allocation12 + $0x4c] sm:$0xf0] }
 0x18c   :  { %1530 = vmatpush.bf16.msra.mxu0 %v2408_v62  ;;  %1556 = vmatpush.bf16.msra.mxu2 %v2416_v11  ;;  %v2360_v51 = vor.u32 %v2627_v44, %v2359_v45  ;;  %v2343_v62 = vld [vmem:[#allocation12 + $0x20] sm:$0xf] }
 0x18f   :  { %1543 = vmatpush.bf16.msra.mxu1 %v2412_v10 }
 0x190   :  { %1557 = vmatpush.bf16.msra.mxu2 %v2400_v6  ;;  %v2335_v6 = vld [vmem:[#allocation12 + $0x8] sm:$0xf] }
 0x193   :  { %1544 = vmatpush.bf16.msra.mxu1 %v2396_v22 }
 0x194   :  { %1558 = vmatpush.bf16.msra.mxu2 %v2384_v41 }
 0x195   :  { %v3114_v43 = vpop.f32.mrf.mxu1 }
 0x197   :  { %1545 = vmatpush.bf16.msra.mxu1 %v2380_v38 }
 0x19d   :  { %v982_v14 = vpop.f32.mrf.mxu1 }
 0x19e   :  { %v2420_v14 = vor.u32 %v2638_v12, %v2417_v13  ;;  %v2344_v12 = vor.u32 %v2623_v63, %v2343_v62  ;;  %v2622_v13 = vld [vmem:[#allocation12 + $0x2c] sm:$0xf] }
 0x1a0   :  { %1569 = vmatpush.bf16.msra.mxu3 %v2420_v14  ;;  %v2353_v14 = vld [vmem:[#allocation12 + $0x38] sm:$0xf0] }
 0x1a1   :  { %v2356_v19 = vor.u32 %v2622_v13, %v2353_v14 }
 0x1d3   :  { %v3116_v3 = vpop.f32.mrf.mxu3 }
 0x1db   :  { %v1008_v9 = vpop.f32.mrf.mxu3 }
 0x1dc   :  { %v2624_v9 = vld [vmem:[#allocation12 + $0x34] sm:$0xf0] }
 0x1dd   :  { %v2352_v17 = vor.u32 %v2624_v9, %v2351_v7 }
 0x1e0   :  { %v915_v61 = vpop.f32.mrf.mxu0 }
 0x1e1   :  { %v916_v4 = vadd.f32 %v915_v61, %v3102_v46  ;;  %v2392_v46 = vor.u32 %v2635_v16, %v2391_v15  ;;  %v2372_v61 = vor.u32 %v2626_v58, %v2369_v59  ;;  %v1014_v15 = vperm.slane %v3121_v30, 2  ;;  %v145_v59 = vld [vmem:[#allocation4] sm:$0x3] }
 0x1e3   :  { %v929_v8 = vadd.f32 %v3110_v55, %v916_v4  ;;  %v2404_v55 = vor.u32 %v2634_v23, %v2401_v1  ;;  %1531 = vmatpush.bf16.msra.mxu0 %v2392_v46  ;;  %v2345_v4 = vld [vmem:[#allocation12 + $0x30] sm:$0xf0]  ;;  %v2327_v46 = vld [vmem:[#allocation12] sm:$0xf]  ;;  %v2620_v23 = vld [vmem:[#allocation12 + $0x14] sm:$0xf0] }
 0x1e4   :  { %v2348_v16 = vor.u32 %v2621_v0, %v2345_v4  ;;  %v2618_v1 = vld [vmem:[#allocation12 + $0xc] sm:$0xf] }
 0x1e5   :  { %v1020_v21 = vadd.f32 %v1012_v53, %v929_v8  ;;  %1570 = vmatpush.bf16.msra.mxu3 %v2404_v55  ;;  %v2367_v53 = vld [vmem:[#allocation12 + $0x48] sm:$0xf] }
 0x1e6   :  { %v941_v24 = vpop.f32.mrf.mxu2  ;;  %v2368_v57 = vor.u32 %v2628_v54, %v2367_v53 }
 0x1e7   :  { %v2194_v26 = vmul.f32 -1.442695, %v1020_v21  ;;  %v942_v27 = vadd.f32 %v941_v24, %v3104_v47  ;;  %1532 = vmatpush.bf16.msra.mxu0 %v2376_v32  ;;  %v2329_v21 = vld [vmem:[#allocation12 + $0x10] sm:$0xf0]  ;;  %v2337_v24 = vld [vmem:[#allocation12 + $0x18] sm:$0xf0] }
 0x1e8   :  { %v917_v31 = vpop.f32.mrf.mxu0  ;;  %1559 = vmatpush.bf16.msra.mxu2 %v2368_v57 }
 0x1e9   :  { %2690 = vpow2.f32 %v2194_v26  ;;  %v955_v37 = vadd.f32 %v3112_v5, %v942_v27  ;;  %v2364_v5 = vor.u32 %v2625_v35, %v2361_v52  ;;  %1571 = vmatpush.bf16.msra.mxu3 %v2388_v42  ;;  %v2332_v26 = vor.u32 %v2617_v20, %v2329_v21 }
 0x1ea   :  { %v2336_v27 = vor.u32 %v2620_v23, %v2335_v6  ;;  %v2340_v31 = vor.u32 %v2618_v1, %v2337_v24  ;;  %v2655_v24 = vld [vmem:[#allocation6 + $0x30] sm:$0xff] }
 0x1eb   :  { %v1021_v47 = vadd.f32 %v1013_v25, %v955_v37  ;;  %1533 = vmatpush.bf16.msra.mxu0 %v2360_v51  ;;  %1546 = vmatpush.bf16.msra.mxu1 %v2364_v5 }
 0x1ec   :  { %1560 = vmatpush.bf16.msra.mxu2 %v2352_v17 }
 0x1ed   :  { %v2195_v56 = vmul.f32 -1.442695, %v1021_v47  ;;  %1572 = vmatpush.bf16.msra.mxu3 %v2372_v61 }
 0x1ee   :  { %v943_v60 = vpop.f32.mrf.mxu2 }
 0x1ef   :  { %v2691_v2 = vpop.eup %2690  ;;  %2692 = vpow2.f32 %v2195_v56  ;;  %1534 = vmatpush.bf16.msra.mxu0 %v2344_v12  ;;  %1547 = vmatpush.bf16.msra.mxu1 %v2348_v16 }
 0x1f0   :  { %v3132_v10 = vadd.f32 1.0, %v2691_v2  ;;  %v967_v11 = vpop.f32.mrf.mxu0  ;;  %1561 = vmatpush.bf16.msra.mxu2 %v2336_v27 }
 0x1f1   :  { %v968_v8 = vadd.f32 %v967_v11, %v3106_v48  ;;  %v2328_v48 = vor.u32 %v2619_v18, %v2327_v46  ;;  %1573 = vmatpush.bf16.msra.mxu3 %v2356_v19 }
 0x1f2   :  { %2694 = vrcp.f32 %v3132_v10  ;;  %v1047_v44 = vand.u32 2147483648, %v3132_v10  ;;  %vm1041_vm12 = vweird.f32 %v3132_v10 }
 0x1f3   :  { %v981_v22 = vadd.f32 %v3114_v43, %v968_v8  ;;  %1535 = vmatpush.bf16.msra.mxu0 %v2328_v48  ;;  %1548 = vmatpush.bf16.msra.mxu1 %v2332_v26  ;;  %v2656_v48 = vld [vmem:[#allocation6 + $0x38] sm:$0xff]  ;;  %v2653_v26 = vld [vmem:[#allocation6 + $0x20] sm:$0xff] }
 0x1f4   :  { %v1048_v56 = vor.u32 1.1754944e-38, %v1047_v44  ;;  %v2649_v44 = vld [vmem:[#allocation6] sm:$0xff] }
 0x1f5   :  { %v2693_v25 = vpop.eup %2692  ;;  %v1022_v55 = vadd.f32 %v1014_v15, %v981_v22  ;;  %1574 = vmatpush.bf16.msra.mxu3 %v2340_v31 }
 0x1f6   :  { %v1034_v28 = vadd.f32 1.0, %v2693_v25  ;;  %v993_v29 = vpop.f32.mrf.mxu2  ;;  %v2654_v25 = vld [vmem:[#allocation6 + $0x28] sm:$0xff] }
 0x1f7   :  { %v2196_v32 = vmul.f32 -1.442695, %v1022_v55  ;;  %v994_v33 = vadd.f32 %v993_v29, %v3108_v50  ;;  %1731 = vmatpush.bf16.msrb.mxu0 %v2656_v48  ;;  %v2453_v55 = vld [vmem:[%s3170_s10 + $0x4] sm:$0xf] }
 0x1f8   :  { %v2695_v43 = vpop.eup %2694  ;;  %2696 = vrcp.f32 %v1034_v28  ;;  %v969_v36 = vpop.f32.mrf.mxu0  ;;  %v1062_v51 = vand.u32 2147483648, %v1034_v28  ;;  %v1060_v54 = vand.u32 2147483647, %v1034_v28  ;;  %vm1056_vm15 = vweird.f32 %v1034_v28 }
 0x1f9   :  { %v1037_v37 = vmul.f32 %v2695_v43, %v3132_v10  ;;  %2698 = vpow2.f32 %v2196_v32  ;;  %v1007_v38 = vadd.f32 %v3116_v3, %v994_v33  ;;  %vm1042_vm11 = vweird.f32 %v2695_v43  ;;  %v2652_v32 = vld [vmem:[#allocation6 + $0x18] sm:$0xff] }
 0x1fa   :  { %v1045_v3 = vand.u32 2147483647, %v3132_v10  ;;  %vm1043_vm13 = vmor %vm1041_vm12, %vm1042_vm11  ;;  %v1063_v58 = vor.u32 1.1754944e-38, %v1062_v51  ;;  %vm1061_vm2 = vcmp.eq.f32.partialorder %v1060_v54, 8.507059e+37  ;;  %v1583_v27 = vperm.slane %v2453_v55, 0 }
 0x1fb   :  { %v1038_v39 = vsub.f32 1.0, %v1037_v37  ;;  %v1023_v40 = vadd.f32 %v1015_v34, %v1007_v38  ;;  %1732 = vmatpush.bf16.msrb.mxu0 %v2655_v24  ;;  %v2651_v37 = vld [vmem:[#allocation6 + $0x10] sm:$0xff] }
 0x1fc   :  { %vm1046_vm0 = vcmp.eq.f32.partialorder %v1045_v3, 8.507059e+37 }
 0x1fd   :  { %v1039_v41 = vmul.f32 %v2695_v43, %v1038_v39  ;;  %2700 = vtanh.f32 %v1023_v40  ;;  %v1585_v40 = vperm.slane %v2453_v55, 2 }
 0x1fe   :  { %v2697_v49 = vpop.eup %2696  ;;  %v995_v47 = vpop.f32.mrf.mxu2 }
 0x1ff   :  { %v2699_v50 = vpop.eup %2698  ;;  %v1052_v42 = vmul.f32 %v2697_v49, %v1034_v28  ;;  %v1040_v45 = vadd.f32 %v2695_v43, %v1039_v41  ;;  %vm1057_vm14 = vweird.f32 %v2697_v49  ;;  %1733 = vmatpush.bf16.msrb.mxu0 %v2654_v25  ;;  %v1584_v28 = vperm.slane %v2453_v55, 1  ;;  %v2650_v41 = vld [vmem:[#allocation6 + $0x8] sm:$0xff] }
 0x200   :  { %v1035_v30 = vadd.f32 1.0, %v2699_v50  ;;  %vm1058_vm1 = vmor %vm1056_vm15, %vm1057_vm14 }
 0x201   :  { %v1053_v35 = vsub.f32 1.0, %v1052_v42  ;;  %v1044_v53 = vsel %vm1043_vm13, %v2695_v43, %v1040_v45 }
 0x202   :  { %2702 = vrcp.f32 %v1035_v30  ;;  %v1049_v60 = vsel %vm1046_vm0, %v1048_v56, %v1044_v53  ;;  %v1077_v10 = vand.u32 2147483648, %v1035_v30  ;;  %v1075_v12 = vand.u32 2147483647, %v1035_v30 }
 0x203   :  { %v1054_v52 = vmul.f32 %v2697_v49, %v1053_v35  ;;  %v2701_v57 = vpop.eup %2700  ;;  %vm1071_vm4 = vweird.f32 %v1035_v30  ;;  %1734 = vmatpush.bf16.msrb.mxu0 %v2653_v26 }
 0x204   :  { %v1083_v4 = vmul.f32 %v2701_v57, %v1049_v60  ;;  %v1078_v14 = vor.u32 1.1754944e-38, %v1077_v10  ;;  %vm1076_vm6 = vcmp.eq.f32.partialorder %v1075_v12, 8.507059e+37  ;;  %v1586_v57 = vperm.slane %v2453_v55, 3 }
 0x205   :  { %v1055_v5 = vadd.f32 %v2697_v49, %v1054_v52 }
 0x206   :  { %v1293_v18 = vpop.f32.mrf.mxu0  ;;  %v1306_v19 = vpop.f32.mrf.mxu1 }
 0x207   :  { %v1059_v61 = vsel %vm1058_vm1, %v2697_v49, %v1055_v5  ;;  %1735 = vmatpush.bf16.msrb.mxu0 %v2652_v32 }
 0x208   :  { %v2703_v62 = vpop.eup %2702  ;;  %v1064_v63 = vsel %vm1061_vm2, %v1063_v58, %v1059_v61 }
 0x209   :  { %v1067_v0 = vmul.f32 %v2703_v62, %v1035_v30  ;;  %v1082_v2 = vmul.f32 %v1064_v63, %v145_v59  ;;  %vm1072_vm3 = vweird.f32 %v2703_v62 }
 0x20a   :  { %vm1073_vm5 = vmor %vm1071_vm4, %vm1072_vm3 }
 0x20b   :  { %v1068_v7 = vsub.f32 1.0, %v1067_v0  ;;  %v1084_v9 = vadd.f32 %v1083_v4, %v1082_v2  ;;  %1736 = vmatpush.bf16.msrb.mxu0 %v2651_v37  ;;  %v2681_v37 = vld [vmem:[%s3168_s8] ss:$0 sm:$0xff] }
 0x20d   :  { %2704 = vtanh.f32 %v1084_v9  ;;  %1088 = vst [vmem:[#allocation4] sm:$0x3] %v1084_v9  ;;  %v1069_v11 = vmul.f32 %v2703_v62, %v1068_v7  ;;  %v1319_v20 = vpop.f32.mrf.mxu2  ;;  %v1332_v22 = vpop.f32.mrf.mxu3 }
 0x20e   :  { %v1295_v21 = vpop.f32.mrf.mxu0  ;;  %v1308_v6 = vpop.f32.mrf.mxu1 }
 0x20f   :  { %v1070_v13 = vadd.f32 %v2703_v62, %v1069_v11  ;;  %1737 = vmatpush.bf16.msrb.mxu0 %v2650_v41 }
 0x211   :  { %v1074_v8 = vsel %vm1073_vm5, %v2703_v62, %v1070_v13 }
 0x212   :  { %v1079_v15 = vsel %vm1076_vm6, %v1078_v14, %v1074_v8 }
 0x213   :  { %v2705_v16 = vpop.eup %2704  ;;  %1738 = vmatpush.bf16.msrb.mxu0 %v2649_v44 }
 0x214   :  { %v1086_v17 = vmul.f32 %v2705_v16, %v1079_v15 }
 0x215   :  { %v1321_v23 = vpop.f32.mrf.mxu2  ;;  %v1334_v1 = vpop.f32.mrf.mxu3 }
 0x216   :  { %1087 = vst [vmem:[#allocation3] sm:$0x3] %v1086_v17  ;;  %v1089_v46 = vpack.c.bf16 %v1086_v17, %v1086_v17 }
 0x218   :  { %1536 = vmatmul.bf16.vlgmr.msra.gmra.mxu0 %v1089_v46  ;;  %1549 = vmatmul.bf16.vlgmr.msra.gmra.mxu1 %v1089_v46 }
 0x219   :  { %1562 = vmatmul.bf16.vlgmr.msra.gmra.mxu2 %v1089_v46  ;;  %1575 = vmatmul.bf16.vlgmr.msra.gmra.mxu3 %v1089_v46 }
 0x295   :  { %v1537_v29 = vpop.f32.mrf.mxu0  ;;  %v1550_v31 = vpop.f32.mrf.mxu1 }
 0x296   :  { %v1538_v33 = vadd.f32 %v1537_v29, %v1293_v18  ;;  %v1551_v43 = vadd.f32 %v1550_v31, %v1306_v19  ;;  %v146_v18 = vld [vmem:[#allocation4 + $0x2] sm:$0x3] }
 0x298   :  { %v1591_v34 = vadd.f32 %v1583_v27, %v1538_v33  ;;  %v1592_v36 = vadd.f32 %v1584_v28, %v1551_v43 }
 0x29a   :  { %v2454_v38 = vmul.f32 -1.442695, %v1591_v34  ;;  %v2455_v39 = vmul.f32 -1.442695, %v1592_v36 }
 0x29c   :  { %2706 = vpow2.f32 %v2454_v38  ;;  %v1563_v49 = vpop.f32.mrf.mxu2  ;;  %v1576_v47 = vpop.f32.mrf.mxu3 }
 0x29d   :  { %2708 = vpow2.f32 %v2455_v39  ;;  %v1564_v50 = vadd.f32 %v1563_v49, %v1319_v20  ;;  %v1539_v42 = vpop.f32.mrf.mxu0  ;;  %v1552_v45 = vpop.f32.mrf.mxu1  ;;  %v1577_v5 = vadd.f32 %v1576_v47, %v1332_v22 }
 0x29f   :  { %v1593_v30 = vadd.f32 %v1585_v40, %v1564_v50  ;;  %v1594_v61 = vadd.f32 %v1586_v57, %v1577_v5 }
 0x2a1   :  { %v2456_v35 = vmul.f32 -1.442695, %v1593_v30 }
 0x2a2   :  { %v2707_v3 = vpop.eup %2706 }
 0x2a3   :  { %v2709_v51 = vpop.eup %2708  ;;  %v1604_v52 = vadd.f32 1.0, %v2707_v3  ;;  %2710 = vpow2.f32 %v2456_v35 }
 0x2a4   :  { %v1605_v53 = vadd.f32 1.0, %v2709_v51  ;;  %v1565_v54 = vpop.f32.mrf.mxu2  ;;  %v1578_v56 = vpop.f32.mrf.mxu3 }
 0x2a5   :  { %2712 = vrcp.f32 %v1604_v52  ;;  %v1618_v7 = vand.u32 2147483648, %v1604_v52  ;;  %v1616_v11 = vand.u32 2147483647, %v1604_v52  ;;  %vm1612_vm9 = vweird.f32 %v1604_v52 }
 0x2a6   :  { %2714 = vrcp.f32 %v1605_v53  ;;  %v1633_v9 = vand.u32 2147483648, %v1605_v53  ;;  %v1631_v13 = vand.u32 2147483647, %v1605_v53  ;;  %vm1627_vm10 = vweird.f32 %v1605_v53 }
 0x2a7   :  { %v1619_v16 = vor.u32 1.1754944e-38, %v1618_v7  ;;  %vm1617_vm13 = vcmp.eq.f32.partialorder %v1616_v11, 8.507059e+37 }
 0x2a8   :  { %v1634_v46 = vor.u32 1.1754944e-38, %v1633_v9  ;;  %vm1632_vm14 = vcmp.eq.f32.partialorder %v1631_v13, 8.507059e+37 }
 0x2a9   :  { %v2711_v58 = vpop.eup %2710 }
 0x2aa   :  { %v1606_v59 = vadd.f32 1.0, %v2711_v58 }
 0x2ab   :  { %v2713_v60 = vpop.eup %2712 }
 0x2ac   :  { %v2715_v62 = vpop.eup %2714  ;;  %v1608_v63 = vmul.f32 %v2713_v60, %v1604_v52  ;;  %2716 = vrcp.f32 %v1606_v59  ;;  %vm1613_vm7 = vweird.f32 %v2713_v60  ;;  %v1648_v26 = vand.u32 2147483648, %v1606_v59 }
 0x2ad   :  { %v1623_v0 = vmul.f32 %v2715_v62, %v1605_v53  ;;  %2718 = vtanh.f32 %v1594_v61  ;;  %vm1628_vm8 = vweird.f32 %v2715_v62  ;;  %vm1614_vm11 = vmor %vm1612_vm9, %vm1613_vm7  ;;  %vm1642_vm0 = vweird.f32 %v1606_v59 }
 0x2ae   :  { %v1609_v2 = vsub.f32 1.0, %v1608_v63  ;;  %vm1629_vm12 = vmor %vm1627_vm10, %vm1628_vm8  ;;  %v1646_v27 = vand.u32 2147483647, %v1606_v59  ;;  %v1649_v29 = vor.u32 1.1754944e-38, %v1648_v26 }
 0x2af   :  { %v1624_v4 = vsub.f32 1.0, %v1623_v0 }
 0x2b0   :  { %v1610_v10 = vmul.f32 %v2713_v60, %v1609_v2  ;;  %vm1647_vm2 = vcmp.eq.f32.partialorder %v1646_v27, 8.507059e+37 }
 0x2b1   :  { %v1625_v12 = vmul.f32 %v2715_v62, %v1624_v4 }
 0x2b2   :  { %v2717_v14 = vpop.eup %2716  ;;  %v1611_v8 = vadd.f32 %v2713_v60, %v1610_v10 }
 0x2b3   :  { %v1638_v15 = vmul.f32 %v2717_v14, %v1606_v59  ;;  %v1626_v17 = vadd.f32 %v2715_v62, %v1625_v12  ;;  %v2719_v20 = vpop.eup %2718  ;;  %vm1643_vm15 = vweird.f32 %v2717_v14 }
 0x2b4   :  { %v1615_v19 = vsel %vm1614_vm11, %v2713_v60, %v1611_v8  ;;  %vm1644_vm1 = vmor %vm1642_vm0, %vm1643_vm15 }
 0x2b5   :  { %v1639_v21 = vsub.f32 1.0, %v1638_v15  ;;  %v1620_v22 = vsel %vm1617_vm13, %v1619_v16, %v1615_v19  ;;  %v1630_v6 = vsel %vm1629_vm12, %v2715_v62, %v1626_v17 }
 0x2b6   :  { %v1635_v23 = vsel %vm1632_vm14, %v1634_v46, %v1630_v6  ;;  %v1654_v1 = vmul.f32 %v2719_v20, %v1620_v22 }
 0x2b7   :  { %v1653_v48 = vmul.f32 %v1635_v23, %v146_v18  ;;  %v1640_v24 = vmul.f32 %v2717_v14, %v1639_v21 }
 0x2b9   :  { %v1655_v25 = vadd.f32 %v1654_v1, %v1653_v48  ;;  %v1641_v55 = vadd.f32 %v2717_v14, %v1640_v24 }
 0x2bb   :  { %2720 = vtanh.f32 %v1655_v25  ;;  %1661 = vst [vmem:[#allocation4 + $0x2] sm:$0x3] %v1655_v25  ;;  %v1645_v28 = vsel %vm1644_vm1, %v2717_v14, %v1641_v55 }
 0x2bc   :  { %v1650_v32 = vsel %vm1647_vm2, %v1649_v29, %v1645_v28 }
 0x2c1   :  { %v2721_v31 = vpop.eup %2720 }
 0x2c2   :  { %v1657_v33 = vmul.f32 %v2721_v31, %v1650_v32  ;;  %v1752_v43 = vld [vmem:[#allocation4] sm:$0xf]  }
 0x2c3   :  { %1754 = vst [vmem:[#allocation17] sm:$0xf] %v1752_v43  }
 0x2c4   :  { %1659 = vst [vmem:[#allocation3 + $0x2] sm:$0x3] %v1657_v33  ;;  %v1662_v34 = vpack.c.bf16 %v1657_v33, %v1657_v33 }
 0x2c6   :  { %1739 = vmatmul.bf16.vlgmr.msrb.gmra.mxu0 %v1662_v34 }
 0x2cb   :  { %v1748_v36 = vld [vmem:[#allocation3] sm:$0xf]  }
 0x2cc   :  { %1750 = vst [vmem:[#allocation15] sm:$0xf] %v1748_v36  }
 0x2cd   :  { %1779 = dma.vmem_to_hbm [thread:$0]  %s1772_s23, 64, %s1774_s20, [#allocation16], %s2911_s24, %s2911_s24, %s2912_s11  }
 0x2ce   :  { %1792 = dma.vmem_to_hbm [thread:$0]  %s1785_s27, 64, %s1787_s22, [#allocation16], %s2911_s24, %s2911_s24, %s2912_s11  }
 0x343   :  { %v1740_v38 = vpop.f32.mrf.mxu0 }
 0x344   :  { %v1741_v39 = vadd.f32 %v2681_v37, %v1740_v38 }
 0x346   :  { %1744 = vst [vmem:[#allocation14] sm:$0x3] %v1741_v39 }
 0x347   :  { %1766 = dma.vmem_to_hbm [thread:$0]  %s1762_s30, 32, %s1764_s4, [#allocation8]  }
 0x34b   :  { %v1742_v40 = vpop.f32.mrf.mxu0 }
 0x34c   :  { %2897 = dma.done.wait [#allocation8], 32  }
 0x34d   :  { %2898 = vsyncadd [#allocation8], 4294967264 }
 0x34e   :  { %2899 = dma.done.wait [#allocation16], 128  }
 0x34f   :  { %2900 = vsyncadd [#allocation16], 4294967168 }
 0x350   :  { %1805 = vsyncpa [#allocation7], 1 }
 0x351   :  { %1806 = vsyncpa [#allocation10], 1 }
 0x352   :  { %1807 = vsyncpa [#allocation13], 1 }
 0x353   :  { %1808 = vsyncpa [#allocation8], 1 }
 0x354   :  { %1809 = vsyncpa [#allocation16], 1 }

</bundles_post_ra>
